<compile_context>
chip_gen: v7x
topology: tpu7x:2x2x1
jax: 0.10.0
libtpu: 0.0.40
codegen_flags: <defaults>
</compile_context>

<pallas_src>
import functools

import jax
import jax.numpy as jnp
from jax.experimental import pallas as pl
from jax.experimental.pallas import tpu as pltpu


def _fold128(a):
    """(C, W) -> (C, 128): sum the W//128 lane groups with vreg-aligned static
    slices (pure VALU adds; no cross-lane XLU work)."""
    w = a.shape[-1]
    r = a[:, 0:128]
    for k in range(1, w // 128):
        r = r + a[:, k * 128:(k + 1) * 128]
    return r


def _iw_sce_kernel(x_ref, t_ref, hist_ref, s_ref, *,
                   ignore_index, num_pixels, tiles_per_split, chunk,
                   needs_mask, unroll):
    """Grid = (image n, pixel-split s, pixel-tile p).

    Accumulates, per (n, s), lane-partial
        hist[c, l] = #pixels (in this split) with argpred == c, folded mod 128
        S[c, l]    = sum over those pixels of sum_k(mask * (-log_softmax) * t)
    into the (1, 1, C, 128) output refs, which stay VMEM-resident across the
    last (reduction) grid axis.
    """
    s_id = pl.program_id(1)
    p_id = pl.program_id(2)

    @pl.when(p_id == 0)
    def _init():
        hist_ref[...] = jnp.zeros_like(hist_ref)
        s_ref[...] = jnp.zeros_like(s_ref)

    C = x_ref.shape[1]
    tp = x_ref.shape[2]
    n_chunks = tp // chunk

    # Global (unclamped) tile index; used only for validity masking. The
    # index_map clamps the DMA source for overhanging tiles, but their lanes
    # all fail the validity test below, so they contribute exactly zero.
    tile_idx = s_id * tiles_per_split + p_id
    pix_base = tile_idx * tp

    # Hoisted constants (JAX does not CSE broadcasts — emit them once).
    cls_idx = jax.lax.broadcasted_iota(jnp.int32, (C, chunk), 0)
    if needs_mask:
        lane = jax.lax.broadcasted_iota(jnp.int32, (1, chunk), 1)
    ignore_val = jnp.asarray(ignore_index, dtype=t_ref.dtype)

    def body(j, carry):
        hist_acc, s_acc = carry
        off = pl.multiple_of(j * chunk, chunk)

        xc = x_ref[0, :, pl.ds(off, chunk)]          # (C, chunk) native dtype
        tc = t_ref[0, :, pl.ds(off, chunk)]          # (C, chunk) native dtype

        # ---- argmax over channel (first maximal index, like torch.max) ----
        xf = xc.astype(jnp.float32)                  # f32 math (exact from bf16)
        m = jnp.max(xf, axis=0, keepdims=True)       # (1, chunk)
        eq = xf == m
        argpred = jnp.min(jnp.where(eq, cls_idx, C), axis=0, keepdims=True)
        oneh = cls_idx == argpred                    # (C, chunk) bool
        # ignore mask in native dtype (-1 is exact in bf16)
        ig = tc != ignore_val                        # (C, chunk) bool

        if needs_mask:
            valid = (pix_base + off + lane) < num_pixels      # (1, chunk)
            oneh = oneh & valid
            ig = ig & valid

        onehot = jnp.where(oneh, jnp.float32(1.0), jnp.float32(0.0))

        # ---- log-softmax pieces + masked NLL, lse factored out ----
        z = xf - m                                   # (C, chunk) f32
        lse = jnp.log(jnp.sum(jnp.exp(z), axis=0, keepdims=True))    # (1, chunk)
        t_m = jnp.where(ig, tc, jnp.asarray(0, tc.dtype)).astype(jnp.float32)
        t_sum = jnp.sum(t_m, axis=0, keepdims=True)                  # (1, chunk)
        tz_sum = jnp.sum(t_m * z, axis=0, keepdims=True)             # (1, chunk)
        s_pix = lse * t_sum - tz_sum                                 # (1, chunk)
        if needs_mask:
            # Garbage lanes of a partial/overhanging tile may carry NaN/Inf in
            # lse/tz_sum; kill them with a select BEFORE routing (0*NaN = NaN).
            s_pix = jnp.where(valid, s_pix, jnp.float32(0.0))

        # ---- fold to 128-lane partials and accumulate in vregs ----
        hist_acc = hist_acc + _fold128(onehot)
        s_acc = s_acc + _fold128(onehot * s_pix)
        return hist_acc, s_acc

    zero = jnp.zeros((C, 128), jnp.float32)
    hist_acc, s_acc = jax.lax.fori_loop(0, n_chunks, body, (zero, zero),
                                        unroll=unroll)

    # Single read-modify-write of the resident accumulators per grid step.
    hist_ref[0, 0] += hist_acc
    s_ref[0, 0] += s_acc


def iw_soft_cross_entropy(inputs_nchw, target_nchw, *,
                          ignore_index=-1, num_class=19, ratio=0.2,
                          tile_pixels=None, num_splits=None):
    """JAX/Pallas equivalent of IWsoftCrossEntropy.forward (NCHW inputs).

    tile_pixels: pixel-tile width (multiple of 128). Default is dtype-aware
    (32768 for 16-bit inputs, 16384 for f32) and capped so the double-buffered
    input blocks stay well inside v7x's 64 MiB VMEM.
    num_splits: parallel split of the pixel axis (default: 2 when N == 1 so
    both v7x TensorCores are used, else 1).
    """
    assert inputs_nchw.shape == target_nchw.shape
    N, C, H, W = inputs_nchw.shape
    assert C == num_class
    P = H * W

    # Pure layout glue: (N, C, H, W) -> (N, C, P). No dtype cast (bf16 stays bf16).
    x = inputs_nchw.reshape(N, C, P)
    t = target_nchw.reshape(N, C, P)

    itemsize = jnp.dtype(inputs_nchw.dtype).itemsize
    if tile_pixels is None:
        tile_pixels = 32768 if itemsize <= 2 else 16384
    # Keep 2 inputs x 2 buffers x (C*tp) under ~24 MiB (v7x-safe).
    tp_cap = max(128, ((24 << 20) // (4 * C * itemsize)) // 128 * 128)
    tp = max(128, (min(tile_pixels, P, tp_cap) // 128) * 128)
    n_t = pl.cdiv(P, tp)

    if num_splits is None:
        num_splits = 2 if (N == 1 and n_t >= 2) else 1
    splits = max(1, min(int(num_splits), n_t))
    tiles_per_split = pl.cdiv(n_t, splits)
    # Mask is only emitted when some lane of some tile falls past P.
    needs_mask = (P % tp != 0) or (tiles_per_split * splits != n_t)

    # Compute chunk: largest of 512/256/128 dividing tp (tp is a multiple of 128).
    chunk = 128
    for c in (512, 256):
        if tp % c == 0:
            chunk = c
            break
    n_chunks = tp // chunk
    unroll = min(n_chunks, 8)

    # Input index map: tile index = s*tiles_per_split + p; clamp only when the
    # split does not divide the tile count (overhang tiles are fully masked).
    if splits == 1:
        def in_map(n, s, p):
            return (n, 0, p)
    elif n_t % splits == 0:
        def in_map(n, s, p):
            return (n, 0, s * tiles_per_split + p)
    else:
        last = n_t - 1

        def in_map(n, s, p):
            return (n, 0, jnp.minimum(s * tiles_per_split + p, last))

    kernel = functools.partial(
        _iw_sce_kernel, ignore_index=ignore_index, num_pixels=P,
        tiles_per_split=tiles_per_split, chunk=chunk,
        needs_mask=needs_mask, unroll=unroll)

    # 2 inputs x 2 buffers (+2x safety) + headroom; clamp to [32, 48] MiB so it
    # is generous on v5e/v6e (128 MiB) yet leaves headroom on v7x (64 MiB).
    vmem_limit = int(min(max(8 * C * tp * itemsize + (8 << 20), 32 << 20),
                         48 << 20))

    hist_p, s_p = pl.pallas_call(
        kernel,
        out_shape=(jax.ShapeDtypeStruct((N, splits, C, 128), jnp.float32),
                   jax.ShapeDtypeStruct((N, splits, C, 128), jnp.float32)),
        grid=(N, splits, tiles_per_split),
        in_specs=[
            pl.BlockSpec((1, C, tp), in_map),
            pl.BlockSpec((1, C, tp), in_map),
        ],
        out_specs=(
            pl.BlockSpec((1, 1, C, 128), lambda n, s, p: (n, s, 0, 0)),
            pl.BlockSpec((1, 1, C, 128), lambda n, s, p: (n, s, 0, 0)),
        ),
        compiler_params=pltpu.CompilerParams(
            # N and split axes independent -> megacore / dual-TC shardable;
            # pixel-tile axis is the resident-accumulator reduction -> last,
            # arbitrary.
            dimension_semantics=("parallel", "parallel", "arbitrary"),
            vmem_limit_bytes=vmem_limit,
        ),
    )(x, t)

    # ---- finalize (tiny, once per image) in plain JAX ----
    hist = jnp.sum(hist_p, axis=(1, 3))      # (N, C) per-class pixel counts
    s_cls = jnp.sum(s_p, axis=(1, 3))        # (N, C) per-class NLL sums
    # hist.sum(per image) == P always (every pixel lands in a bin) -> static.
    total_pow = float(P) ** (1.0 - ratio)
    denom = jnp.where(hist > 0, hist ** ratio, 0.0) * total_pow
    wclass = 1.0 / jnp.maximum(denom, 1.0)   # (N, C)
    return jnp.sum(wclass * s_cls) / (N * num_class)


def _reference(inputs, target, ignore_index, num_class, ratio):
    """Pure-JAX reference of the same semantics (for verification)."""
    N, C, H, W = inputs.shape
    inputs = inputs.astype(jnp.float32)
    target = target.astype(jnp.float32)
    argpred = jnp.argmax(inputs, axis=1)                                   # (N, H, W)
    onehot = jax.nn.one_hot(argpred.reshape(N, -1), num_class)             # (N, P, C)
    hist = onehot.sum(axis=1)                                              # (N, C)
    denom = jnp.where(hist > 0, hist ** ratio, 0.0) * \
        hist.sum(axis=1, keepdims=True) ** (1.0 - ratio)
    wclass = 1.0 / jnp.maximum(denom, 1.0)                                 # (N, C)
    wpix = jnp.take_along_axis(wclass, argpred.reshape(N, -1), axis=1)
    wpix = wpix.reshape(N, 1, H, W)
    ll = jax.nn.log_softmax(inputs, axis=1)
    mask = target != ignore_index
    return jnp.sum(jnp.where(mask, -ll * target * wpix, 0.0)) / (N * num_class)


if __name__ == "__main__":
    key = jax.random.PRNGKey(0)
    k1, k2, k3, k4 = jax.random.split(key, 4)

    # ---- case 1: f32, ragged spatial size -> partial-tile masking, multi-chunk
    #      inner loop, multi-tile accumulation along the reduction axis ----
    N, C, H, W = 2, 19, 20, 23
    inputs = jax.random.normal(k1, (N, C, H, W), dtype=jnp.float32)
    target = jax.nn.softmax(
        jax.random.normal(k2, (N, C, H, W), dtype=jnp.float32), axis=1)
    target = target.at[:, :, :4, :4].set(-1.0)   # exercise ignore_index mask

    loss = jax.block_until_ready(
        iw_soft_cross_entropy(inputs, target, ignore_index=-1, num_class=C,
                              ratio=0.2))
    ref = _reference(inputs, target, -1, C, 0.2)
    assert jnp.allclose(loss, ref, rtol=2e-5, atol=1e-6), (float(loss), float(ref))

    # small explicit tile: more grid steps along the reduction axis
    loss_small = jax.block_until_ready(
        iw_soft_cross_entropy(inputs, target, ignore_index=-1, num_class=C,
                              ratio=0.2, tile_pixels=128))
    assert jnp.allclose(loss_small, ref, rtol=2e-5, atol=1e-6), (
        float(loss_small), float(ref))

    # ---- case 2: bf16 inputs (no wrapper upcast; f32 in-kernel math/accum) ----
    inputs_bf16 = inputs.astype(jnp.bfloat16)
    target_bf16 = target.astype(jnp.bfloat16)
    target_bf16 = target_bf16.at[:, :, :4, :4].set(-1.0)   # keep ignore marker exact
    loss_bf16 = jax.block_until_ready(
        iw_soft_cross_entropy(inputs_bf16, target_bf16, ignore_index=-1,
                              num_class=C, ratio=0.2))
    ref_bf16 = _reference(inputs_bf16, target_bf16, -1, C, 0.2)
    assert jnp.allclose(loss_bf16, ref_bf16, rtol=1e-4, atol=1e-6), (
        float(loss_bf16), float(ref_bf16))

    # ---- case 3: N == 1 -> 2-way pixel split (v7x dual-TC path); odd tile
    #      count exercises the clamped, fully-masked overhang tile ----
    N1, H1, W1 = 1, 15, 20
    x1 = jax.random.normal(k3, (N1, C, H1, W1), dtype=jnp.float32)
    t1 = jax.nn.softmax(
        jax.random.normal(k4, (N1, C, H1, W1), dtype=jnp.float32), axis=1)
    t1 = t1.at[:, :, :3, :3].set(-1.0)
    loss1 = jax.block_until_ready(
        iw_soft_cross_entropy(x1, t1, ignore_index=-1, num_class=C, ratio=0.2,
                              tile_pixels=128))
    ref1 = _reference(x1, t1, -1, C, 0.2)
    assert jnp.allclose(loss1, ref1, rtol=2e-5, atol=1e-6), (float(loss1), float(ref1))

    print("KERNEL_OK")
</pallas_src>

<mosaic_0001>
module attributes {stable_mosaic.version = 11 : i64} {
  func.func @_iw_sce_kernel(%arg0: i32, %arg1: i32, %arg2: i32, %arg3: memref<1x19x384xf32, #tpu.memory_space<vmem>>, %arg4: memref<1x19x384xf32, #tpu.memory_space<vmem>>, %arg5: memref<1x1x19x128xf32, #tpu.memory_space<vmem>>, %arg6: memref<1x1x19x128xf32, #tpu.memory_space<vmem>>) attributes {dimension_semantics = [#tpu.dimension_semantics<parallel>, #tpu.dimension_semantics<parallel>, #tpu.dimension_semantics<arbitrary>], iteration_bounds = array<i64: 2, 1, 2>, scalar_prefetch = 0 : i64, scratch_operands = 0 : i64, tpu.core_type = #tpu.core_type<tc>, window_params = [{transform_indices = @transform_0, window_bounds = array<i64: 1, 19, 384>}, {transform_indices = @transform_1, window_bounds = array<i64: 1, 19, 384>}, {transform_indices = @transform_2, window_bounds = array<i64: 1, 1, 19, 128>}, {transform_indices = @transform_3, window_bounds = array<i64: 1, 1, 19, 128>}]} {
    %c0_i32 = arith.constant 0 : i32
    %0 = arith.cmpi eq, %arg2, %c0_i32 : i32
    %1 = arith.extui %0 : i1 to i32
    %c0_i32_0 = arith.constant 0 : i32
    %2 = arith.cmpi ne, %1, %c0_i32_0 : i32
    scf.if %2 {
      %cst_64 = arith.constant 0.000000e+00 : f32
      %180 = vector.broadcast %cst_64 : f32 to vector<1x1x19x128xf32>
      %c0_65 = arith.constant 0 : index
      %c0_66 = arith.constant 0 : index
      %c0_67 = arith.constant 0 : index
      %c0_68 = arith.constant 0 : index
      %181 = vector.load %arg5[%c0_65, %c0_66, %c0_67, %c0_68] : memref<1x1x19x128xf32, #tpu.memory_space<vmem>>, vector<1x1x19x128xf32>
      tpu.vector_store %arg5[%c0_65, %c0_66, %c0_67, %c0_68], %180 {strides = array<i32>} : memref<1x1x19x128xf32, #tpu.memory_space<vmem>>, vector<1x1x19x128xf32>,
      %cst_69 = arith.constant 0.000000e+00 : f32
      %182 = vector.broadcast %cst_69 : f32 to vector<1x1x19x128xf32>
      %c0_70 = arith.constant 0 : index
      %c0_71 = arith.constant 0 : index
      %c0_72 = arith.constant 0 : index
      %c0_73 = arith.constant 0 : index
      %183 = vector.load %arg6[%c0_70, %c0_71, %c0_72, %c0_73] : memref<1x1x19x128xf32, #tpu.memory_space<vmem>>, vector<1x1x19x128xf32>
      tpu.vector_store %arg6[%c0_70, %c0_71, %c0_72, %c0_73], %182 {strides = array<i32>} : memref<1x1x19x128xf32, #tpu.memory_space<vmem>>, vector<1x1x19x128xf32>,
    } else {
    }
    %c2_i32 = arith.constant 2 : i32
    %3 = arith.muli %arg1, %c2_i32 : i32
    %4 = arith.addi %3, %arg2 : i32
    %c384_i32 = arith.constant 384 : i32
    %5 = arith.muli %4, %c384_i32 : i32
    %6 = tpu.iota {dimensions = array<i32: 0>} : vector<19x128xi32>
    %7 = tpu.iota {dimensions = array<i32: 1>} : vector<1x128xi32>
    %cst = arith.constant 0.000000e+00 : f32
    %8 = vector.broadcast %cst : f32 to vector<19x128xf32>
    %cst_1 = arith.constant -1.000000e+00 : f32
    %c0_i32_2 = arith.constant 0 : i32
    %c128_i32 = arith.constant 128 : i32
    %9 = arith.muli %c0_i32_2, %c128_i32 : i32
    %10 = tpu.assume_multiple %9, 128 : i32
    %c0 = arith.constant 0 : index
    %c0_3 = arith.constant 0 : index
    %11 = arith.index_cast %10 : i32 to index
    %12 = vector.load %arg3[%c0, %c0_3, %11] : memref<1x19x384xf32, #tpu.memory_space<vmem>>, vector<1x19x128xf32>
    %13 = vector.shape_cast %12 : vector<1x19x128xf32> to vector<19x128xf32>
    %c0_4 = arith.constant 0 : index
    %c0_5 = arith.constant 0 : index
    %14 = arith.index_cast %10 : i32 to index
    %15 = vector.load %arg4[%c0_4, %c0_5, %14] : memref<1x19x384xf32, #tpu.memory_space<vmem>>, vector<1x19x128xf32>
    %16 = vector.shape_cast %15 : vector<1x19x128xf32> to vector<19x128xf32>
    %cst_6 = arith.constant dense<0xFF800000> : vector<128xf32>
    %17 = vector.multi_reduction <maximumf>, %13, %cst_6 [0] : vector<19x128xf32> to vector<128xf32>
    %18 = vector.shape_cast %17 : vector<128xf32> to vector<1x128xf32>
    %19 = vector.broadcast %18 : vector<1x128xf32> to vector<19x128xf32>
    %20 = arith.cmpf oeq, %13, %19 : vector<19x128xf32>
    %c19_i32 = arith.constant 19 : i32
    %21 = vector.broadcast %c19_i32 : i32 to vector<19x128xi32>
    %22 = arith.select %20, %6, %21 : vector<19x128xi1>, vector<19x128xi32>
    %cst_7 = arith.constant dense<2147483647> : vector<128xi32>
    %23 = vector.multi_reduction <minsi>, %22, %cst_7 [0] : vector<19x128xi32> to vector<128xi32>
    %24 = vector.shape_cast %23 : vector<128xi32> to vector<1x128xi32>
    %25 = vector.broadcast %24 : vector<1x128xi32> to vector<19x128xi32>
    %26 = arith.cmpi eq, %6, %25 : vector<19x128xi32>
    %27 = vector.broadcast %cst_1 : f32 to vector<19x128xf32>
    %28 = arith.cmpf one, %16, %27 : vector<19x128xf32>
    %29 = arith.addi %5, %10 : i32
    %30 = vector.broadcast %29 : i32 to vector<1x128xi32>
    %31 = arith.addi %30, %7 : vector<1x128xi32>
    %c460_i32 = arith.constant 460 : i32
    %32 = vector.broadcast %c460_i32 : i32 to vector<1x128xi32>
    %33 = arith.cmpi slt, %31, %32 : vector<1x128xi32>
    %34 = vector.broadcast %33 : vector<1x128xi1> to vector<19x128xi1>
    %35 = arith.andi %26, %34 : vector<19x128xi1>
    %36 = vector.broadcast %33 : vector<1x128xi1> to vector<19x128xi1>
    %37 = arith.andi %28, %36 : vector<19x128xi1>
    %cst_8 = arith.constant 1.000000e+00 : f32
    %cst_9 = arith.constant 0.000000e+00 : f32
    %38 = vector.broadcast %cst_8 : f32 to vector<19x128xf32>
    %39 = vector.broadcast %cst_9 : f32 to vector<19x128xf32>
    %40 = arith.select %35, %38, %39 : vector<19x128xi1>, vector<19x128xf32>
    %41 = vector.broadcast %18 : vector<1x128xf32> to vector<19x128xf32>
    %42 = arith.subf %13, %41 : vector<19x128xf32>
    %43 = math.exp %42 : vector<19x128xf32>
    %cst_10 = arith.constant dense<0.000000e+00> : vector<128xf32>
    %44 = vector.multi_reduction <add>, %43, %cst_10 [0] : vector<19x128xf32> to vector<128xf32>
    %45 = vector.shape_cast %44 : vector<128xf32> to vector<1x128xf32>
    %46 = math.log %45 : vector<1x128xf32>
    %cst_11 = arith.constant 0.000000e+00 : f32
    %47 = vector.broadcast %cst_11 : f32 to vector<19x128xf32>
    %48 = arith.select %37, %16, %47 : vector<19x128xi1>, vector<19x128xf32>
    %cst_12 = arith.constant dense<0.000000e+00> : vector<128xf32>
    %49 = vector.multi_reduction <add>, %48, %cst_12 [0] : vector<19x128xf32> to vector<128xf32>
    %50 = vector.shape_cast %49 : vector<128xf32> to vector<1x128xf32>
    %51 = arith.mulf %48, %42 : vector<19x128xf32>
    %cst_13 = arith.constant dense<0.000000e+00> : vector<128xf32>
    %52 = vector.multi_reduction <add>, %51, %cst_13 [0] : vector<19x128xf32> to vector<128xf32>
    %53 = vector.shape_cast %52 : vector<128xf32> to vector<1x128xf32>
    %54 = arith.mulf %46, %50 : vector<1x128xf32>
    %55 = arith.subf %54, %53 : vector<1x128xf32>
    %cst_14 = arith.constant 0.000000e+00 : f32
    %56 = vector.broadcast %cst_14 : f32 to vector<1x128xf32>
    %57 = arith.select %33, %55, %56 : vector<1x128xi1>, vector<1x128xf32>
    %58 = arith.addf %8, %40 : vector<19x128xf32>
    %59 = vector.broadcast %57 : vector<1x128xf32> to vector<19x128xf32>
    %60 = arith.mulf %40, %59 : vector<19x128xf32>
    %61 = arith.addf %8, %60 : vector<19x128xf32>
    %c1_i32 = arith.constant 1 : i32
    %c128_i32_15 = arith.constant 128 : i32
    %62 = arith.muli %c1_i32, %c128_i32_15 : i32
    %63 = tpu.assume_multiple %62, 128 : i32
    %c0_16 = arith.constant 0 : index
    %c0_17 = arith.constant 0 : index
    %64 = arith.index_cast %63 : i32 to index
    %65 = vector.load %arg3[%c0_16, %c0_17, %64] : memref<1x19x384xf32, #tpu.memory_space<vmem>>, vector<1x19x128xf32>
    %66 = vector.shape_cast %65 : vector<1x19x128xf32> to vector<19x128xf32>
    %c0_18 = arith.constant 0 : index
    %c0_19 = arith.constant 0 : index
    %67 = arith.index_cast %63 : i32 to index
    %68 = vector.load %arg4[%c0_18, %c0_19, %67] : memref<1x19x384xf32, #tpu.memory_space<vmem>>, vector<1x19x128xf32>
    %69 = vector.shape_cast %68 : vector<1x19x128xf32> to vector<19x128xf32>
    %cst_20 = arith.constant dense<0xFF800000> : vector<128xf32>
    %70 = vector.multi_reduction <maximumf>, %66, %cst_20 [0] : vector<19x128xf32> to vector<128xf32>
    %71 = vector.shape_cast %70 : vector<128xf32> to vector<1x128xf32>
    %72 = vector.broadcast %71 : vector<1x128xf32> to vector<19x128xf32>
    %73 = arith.cmpf oeq, %66, %72 : vector<19x128xf32>
    %c19_i32_21 = arith.constant 19 : i32
    %74 = vector.broadcast %c19_i32_21 : i32 to vector<19x128xi32>
    %75 = arith.select %73, %6, %74 : vector<19x128xi1>, vector<19x128xi32>
    %cst_22 = arith.constant dense<2147483647> : vector<128xi32>
    %76 = vector.multi_reduction <minsi>, %75, %cst_22 [0] : vector<19x128xi32> to vector<128xi32>
    %77 = vector.shape_cast %76 : vector<128xi32> to vector<1x128xi32>
    %78 = vector.broadcast %77 : vector<1x128xi32> to vector<19x128xi32>
    %79 = arith.cmpi eq, %6, %78 : vector<19x128xi32>
    %80 = vector.broadcast %cst_1 : f32 to vector<19x128xf32>
    %81 = arith.cmpf one, %69, %80 : vector<19x128xf32>
    %82 = arith.addi %5, %63 : i32
    %83 = vector.broadcast %82 : i32 to vector<1x128xi32>
    %84 = arith.addi %83, %7 : vector<1x128xi32>
    %c460_i32_23 = arith.constant 460 : i32
    %85 = vector.broadcast %c460_i32_23 : i32 to vector<1x128xi32>
    %86 = arith.cmpi slt, %84, %85 : vector<1x128xi32>
    %87 = vector.broadcast %86 : vector<1x128xi1> to vector<19x128xi1>
    %88 = arith.andi %79, %87 : vector<19x128xi1>
    %89 = vector.broadcast %86 : vector<1x128xi1> to vector<19x128xi1>
    %90 = arith.andi %81, %89 : vector<19x128xi1>
    %cst_24 = arith.constant 1.000000e+00 : f32
    %cst_25 = arith.constant 0.000000e+00 : f32
    %91 = vector.broadcast %cst_24 : f32 to vector<19x128xf32>
    %92 = vector.broadcast %cst_25 : f32 to vector<19x128xf32>
    %93 = arith.select %88, %91, %92 : vector<19x128xi1>, vector<19x128xf32>
    %94 = vector.broadcast %71 : vector<1x128xf32> to vector<19x128xf32>
    %95 = arith.subf %66, %94 : vector<19x128xf32>
    %96 = math.exp %95 : vector<19x128xf32>
    %cst_26 = arith.constant dense<0.000000e+00> : vector<128xf32>
    %97 = vector.multi_reduction <add>, %96, %cst_26 [0] : vector<19x128xf32> to vector<128xf32>
    %98 = vector.shape_cast %97 : vector<128xf32> to vector<1x128xf32>
    %99 = math.log %98 : vector<1x128xf32>
    %cst_27 = arith.constant 0.000000e+00 : f32
    %100 = vector.broadcast %cst_27 : f32 to vector<19x128xf32>
    %101 = arith.select %90, %69, %100 : vector<19x128xi1>, vector<19x128xf32>
    %cst_28 = arith.constant dense<0.000000e+00> : vector<128xf32>
    %102 = vector.multi_reduction <add>, %101, %cst_28 [0] : vector<19x128xf32> to vector<128xf32>
    %103 = vector.shape_cast %102 : vector<128xf32> to vector<1x128xf32>
    %104 = arith.mulf %101, %95 : vector<19x128xf32>
    %cst_29 = arith.constant dense<0.000000e+00> : vector<128xf32>
    %105 = vector.multi_reduction <add>, %104, %cst_29 [0] : vector<19x128xf32> to vector<128xf32>
    %106 = vector.shape_cast %105 : vector<128xf32> to vector<1x128xf32>
    %107 = arith.mulf %99, %103 : vector<1x128xf32>
    %108 = arith.subf %107, %106 : vector<1x128xf32>
    %cst_30 = arith.constant 0.000000e+00 : f32
    %109 = vector.broadcast %cst_30 : f32 to vector<1x128xf32>
    %110 = arith.select %86, %108, %109 : vector<1x128xi1>, vector<1x128xf32>
    %111 = arith.addf %58, %93 : vector<19x128xf32>
    %112 = vector.broadcast %110 : vector<1x128xf32> to vector<19x128xf32>
    %113 = arith.mulf %93, %112 : vector<19x128xf32>
    %114 = arith.addf %61, %113 : vector<19x128xf32>
    %c2_i32_31 = arith.constant 2 : i32
    %c128_i32_32 = arith.constant 128 : i32
    %115 = arith.muli %c2_i32_31, %c128_i32_32 : i32
    %116 = tpu.assume_multiple %115, 128 : i32
    %c0_33 = arith.constant 0 : index
    %c0_34 = arith.constant 0 : index
    %117 = arith.index_cast %116 : i32 to index
    %118 = vector.load %arg3[%c0_33, %c0_34, %117] : memref<1x19x384xf32, #tpu.memory_space<vmem>>, vector<1x19x128xf32>
    %119 = vector.shape_cast %118 : vector<1x19x128xf32> to vector<19x128xf32>
    %c0_35 = arith.constant 0 : index
    %c0_36 = arith.constant 0 : index
    %120 = arith.index_cast %116 : i32 to index
    %121 = vector.load %arg4[%c0_35, %c0_36, %120] : memref<1x19x384xf32, #tpu.memory_space<vmem>>, vector<1x19x128xf32>
    %122 = vector.shape_cast %121 : vector<1x19x128xf32> to vector<19x128xf32>
    %cst_37 = arith.constant dense<0xFF800000> : vector<128xf32>
    %123 = vector.multi_reduction <maximumf>, %119, %cst_37 [0] : vector<19x128xf32> to vector<128xf32>
    %124 = vector.shape_cast %123 : vector<128xf32> to vector<1x128xf32>
    %125 = vector.broadcast %124 : vector<1x128xf32> to vector<19x128xf32>
    %126 = arith.cmpf oeq, %119, %125 : vector<19x128xf32>
    %c19_i32_38 = arith.constant 19 : i32
    %127 = vector.broadcast %c19_i32_38 : i32 to vector<19x128xi32>
    %128 = arith.select %126, %6, %127 : vector<19x128xi1>, vector<19x128xi32>
    %cst_39 = arith.constant dense<2147483647> : vector<128xi32>
    %129 = vector.multi_reduction <minsi>, %128, %cst_39 [0] : vector<19x128xi32> to vector<128xi32>
    %130 = vector.shape_cast %129 : vector<128xi32> to vector<1x128xi32>
    %131 = vector.broadcast %130 : vector<1x128xi32> to vector<19x128xi32>
    %132 = arith.cmpi eq, %6, %131 : vector<19x128xi32>
    %133 = vector.broadcast %cst_1 : f32 to vector<19x128xf32>
    %134 = arith.cmpf one, %122, %133 : vector<19x128xf32>
    %135 = arith.addi %5, %116 : i32
    %136 = vector.broadcast %135 : i32 to vector<1x128xi32>
    %137 = arith.addi %136, %7 : vector<1x128xi32>
    %c460_i32_40 = arith.constant 460 : i32
    %138 = vector.broadcast %c460_i32_40 : i32 to vector<1x128xi32>
    %139 = arith.cmpi slt, %137, %138 : vector<1x128xi32>
    %140 = vector.broadcast %139 : vector<1x128xi1> to vector<19x128xi1>
    %141 = arith.andi %132, %140 : vector<19x128xi1>
    %142 = vector.broadcast %139 : vector<1x128xi1> to vector<19x128xi1>
    %143 = arith.andi %134, %142 : vector<19x128xi1>
    %cst_41 = arith.constant 1.000000e+00 : f32
    %cst_42 = arith.constant 0.000000e+00 : f32
    %144 = vector.broadcast %cst_41 : f32 to vector<19x128xf32>
    %145 = vector.broadcast %cst_42 : f32 to vector<19x128xf32>
    %146 = arith.select %141, %144, %145 : vector<19x128xi1>, vector<19x128xf32>
    %147 = vector.broadcast %124 : vector<1x128xf32> to vector<19x128xf32>
    %148 = arith.subf %119, %147 : vector<19x128xf32>
    %149 = math.exp %148 : vector<19x128xf32>
    %cst_43 = arith.constant dense<0.000000e+00> : vector<128xf32>
    %150 = vector.multi_reduction <add>, %149, %cst_43 [0] : vector<19x128xf32> to vector<128xf32>
    %151 = vector.shape_cast %150 : vector<128xf32> to vector<1x128xf32>
    %152 = math.log %151 : vector<1x128xf32>
    %cst_44 = arith.constant 0.000000e+00 : f32
    %153 = vector.broadcast %cst_44 : f32 to vector<19x128xf32>
    %154 = arith.select %143, %122, %153 : vector<19x128xi1>, vector<19x128xf32>
    %cst_45 = arith.constant dense<0.000000e+00> : vector<128xf32>
    %155 = vector.multi_reduction <add>, %154, %cst_45 [0] : vector<19x128xf32> to vector<128xf32>
    %156 = vector.shape_cast %155 : vector<128xf32> to vector<1x128xf32>
    %157 = arith.mulf %154, %148 : vector<19x128xf32>
    %cst_46 = arith.constant dense<0.000000e+00> : vector<128xf32>
    %158 = vector.multi_reduction <add>, %157, %cst_46 [0] : vector<19x128xf32> to vector<128xf32>
    %159 = vector.shape_cast %158 : vector<128xf32> to vector<1x128xf32>
    %160 = arith.mulf %152, %156 : vector<1x128xf32>
    %161 = arith.subf %160, %159 : vector<1x128xf32>
    %cst_47 = arith.constant 0.000000e+00 : f32
    %162 = vector.broadcast %cst_47 : f32 to vector<1x128xf32>
    %163 = arith.select %139, %161, %162 : vector<1x128xi1>, vector<1x128xf32>
    %164 = arith.addf %111, %146 : vector<19x128xf32>
    %165 = vector.broadcast %163 : vector<1x128xf32> to vector<19x128xf32>
    %166 = arith.mulf %146, %165 : vector<19x128xf32>
    %167 = arith.addf %114, %166 : vector<19x128xf32>
    %c3_i32 = arith.constant 3 : i32
    %c0_48 = arith.constant 0 : index
    %c0_49 = arith.constant 0 : index
    %c0_50 = arith.constant 0 : index
    %c0_51 = arith.constant 0 : index
    %168 = vector.load %arg5[%c0_48, %c0_49, %c0_50, %c0_51] : memref<1x1x19x128xf32, #tpu.memory_space<vmem>>, vector<1x1x19x128xf32>
    %169 = vector.shape_cast %168 : vector<1x1x19x128xf32> to vector<19x128xf32>
    %170 = arith.addf %169, %164 : vector<19x128xf32>
    %c0_52 = arith.constant 0 : index
    %c0_53 = arith.constant 0 : index
    %c0_54 = arith.constant 0 : index
    %c0_55 = arith.constant 0 : index
    %171 = vector.load %arg5[%c0_52, %c0_53, %c0_54, %c0_55] : memref<1x1x19x128xf32, #tpu.memory_space<vmem>>, vector<1x1x19x128xf32>
    %172 = vector.shape_cast %171 : vector<1x1x19x128xf32> to vector<19x128xf32>
    %173 = vector.shape_cast %170 : vector<19x128xf32> to vector<1x1x19x128xf32>
    tpu.vector_store %arg5[%c0_52, %c0_53, %c0_54, %c0_55], %173 {strides = array<i32>} : memref<1x1x19x128xf32, #tpu.memory_space<vmem>>, vector<1x1x19x128xf32>,
    %c0_56 = arith.constant 0 : index
    %c0_57 = arith.constant 0 : index
    %c0_58 = arith.constant 0 : index
    %c0_59 = arith.constant 0 : index
    %174 = vector.load %arg6[%c0_56, %c0_57, %c0_58, %c0_59] : memref<1x1x19x128xf32, #tpu.memory_space<vmem>>, vector<1x1x19x128xf32>
    %175 = vector.shape_cast %174 : vector<1x1x19x128xf32> to vector<19x128xf32>
    %176 = arith.addf %175, %167 : vector<19x128xf32>
    %c0_60 = arith.constant 0 : index
    %c0_61 = arith.constant 0 : index
    %c0_62 = arith.constant 0 : index
    %c0_63 = arith.constant 0 : index
    %177 = vector.load %arg6[%c0_60, %c0_61, %c0_62, %c0_63] : memref<1x1x19x128xf32, #tpu.memory_space<vmem>>, vector<1x1x19x128xf32>
    %178 = vector.shape_cast %177 : vector<1x1x19x128xf32> to vector<19x128xf32>
    %179 = vector.shape_cast %176 : vector<19x128xf32> to vector<1x1x19x128xf32>
    tpu.vector_store %arg6[%c0_60, %c0_61, %c0_62, %c0_63], %179 {strides = array<i32>} : memref<1x1x19x128xf32, #tpu.memory_space<vmem>>, vector<1x1x19x128xf32>,
    return
  }
  func.func @transform_0(%arg0: i32, %arg1: i32, %arg2: i32) -> (i32, i32, i32) {
    %c0_i32 = arith.constant 0 : i32
    %c0_i32_0 = arith.constant 0 : i32
    return %arg0, %c0_i32, %arg2 : i32, i32, i32
  }
  func.func @transform_1(%arg0: i32, %arg1: i32, %arg2: i32) -> (i32, i32, i32) {
    %c0_i32 = arith.constant 0 : i32
    %c0_i32_0 = arith.constant 0 : i32
    return %arg0, %c0_i32, %arg2 : i32, i32, i32
  }
  func.func @transform_2(%arg0: i32, %arg1: i32, %arg2: i32) -> (i32, i32, i32, i32) {
    %c0_i32 = arith.constant 0 : i32
    %c0_i32_0 = arith.constant 0 : i32
    %c0_i32_1 = arith.constant 0 : i32
    return %arg0, %arg1, %c0_i32, %c0_i32_0 : i32, i32, i32, i32
  }
  func.func @transform_3(%arg0: i32, %arg1: i32, %arg2: i32) -> (i32, i32, i32, i32) {
    %c0_i32 = arith.constant 0 : i32
    %c0_i32_0 = arith.constant 0 : i32
    %c0_i32_1 = arith.constant 0 : i32
    return %arg0, %arg1, %c0_i32, %c0_i32_0 : i32, i32, i32, i32
  }
}

</mosaic_0001>

<bundles_post_ra>
// kernel: tpu_custom_call.1
= control target key start
LH: loop header
LB: loop body
LE: loop exit
PB: predicated region body
PF: predicated region fallthrough
CT: control target
= control target key end

     0   :  { %s3679_s0 = inlined_call_operand.vmem [shape: f32[2,19,460], index: 0, kind: input, shape index: {}]   ;;  %s3680_s1 = inlined_call_operand.vmem [shape: f32[2,19,460], index: 1, kind: input, shape index: {}]   ;;  %s3681_s2 = inlined_call_operand.vmem [shape: f32[2,1,19,128], index: 2, kind: output, shape index: {0}]   ;;  %s3682_s3 = inlined_call_operand.vmem [shape: f32[2,1,19,128], index: 3, kind: output, shape index: {1}]  }
   0x1   :  { %3685 = sst [smem:[#allocation5_spill]] %s3679_s0 }
   0x2   :  { %s2657_s12 = smov 0   ;;  %s2659_s13 = smov 0  }
   0x3   :  { %s2661_s14 = smov 0   ;;  %s2663_s15 = smov 0  }
   0x4   :  { %s2665_s16 = smov 0   ;;  %s2667_s17 = smov 0  }
   0x5   :  { %s2669_s18 = smov 0  }
   0x6 LB: > { %s26_s19 = sadd.s32 1, %s2493_s16  ;;  %s33_s20 = sadd.s32 1, %s2497_s17  ;;  %s2501_s18 = sphi %s2669_s18, %s14_s18   ;;  %s2497_s17 = sphi %s2667_s17, %s3738_s17   ;;  %s2493_s16 = sphi %s2665_s16, %s3737_s16   ;;  %s2489_s15 = sphi %s2663_s15, %s3736_s15   ;;  %s2485_s14 = sphi %s2661_s14, %s3735_s14   ;;  %s2481_s13 = sphi %s2659_s13, %s3734_s13   ;;  %s2477_s12 = sphi %s2657_s12, %s3733_s12  }
   0x7   : > { %p27_p0 = scmp.ge.s32.totalorder %s26_s19, 2  ;;  %p49_p1 = scmp.ne.s32.totalorder %s2481_s13, %s2477_s12 }
   0x8   : > { %p50_p2 = scmp.eq.s32.totalorder %s2501_s18, 0  ;;  %s42_s25 = sadd.s32 1, %s2481_s13 }
   0x9   : > { %s3740_s19 = smov (%p27_p0, %s26_s19), 0  ;;  %s3742_s20 = smov (!%p27_p0, %s33_s20), %s2497_s17 }
   0xa   : > { %p2700_p3 = por %p50_p2, %p49_p1  ;;  %p35_p4 = scmp.ge.s32.totalorder %s3742_s20, 2 }
   0xb   : > { %s38_s22 = ssub.s32 %s2493_s16, %s3740_s19  ;;  %p1896_p6 = scmp.ge.s32.totalorder %s2501_s18, 4 }
   0xc   : > { %s3744_s20 = smov (%p35_p4, %s3742_s20), 0 }
   0xd   : > { %3687 = sst [smem:[#allocation4_spill]] %s3744_s20  ;;  %s37_s23 = ssub.s32 %s2497_s17, %s3744_s20 }
   0xe   : > { %s39_s24 = sor.u32 %s38_s22, %s37_s23  ;;  %159 = sbr.rel (%p1896_p6) target bundleno = 369 (0x171), region = 16 }
   0xf   : > { %p40_p5 = scmp.eq.s32.totalorder %s39_s24, 0 }
  0x11   : > { %s2712_s26 = scalar_select %p40_p5, %s2481_s13, %s42_s25  }
  0x15   : > { %162 = sbr.rel (!%p2700_p3) target bundleno = 195 (0xc3), region = 20  ;;  %s164_s27 = sand.u32 (%p2700_p3), 1, %s2481_s13  }
  0x16   : > { %s167_s28 = smul.u32 (%p2700_p3), 3, %s2493_s16  ;;  %s3688_s0 = sld [smem:[#allocation5_spill]] (%p2700_p3) }
  0x17   : > { %s1951_s29 = smul.u32 (%p2700_p3), 72, %s164_s27 }
  0x18   : > { %s168_s30 = ssub.s32 (%p2700_p3), 4, %s167_s28  ;;  %s1952_s4 = smul.u32 (%p2700_p3), 12, %s2497_s17 }
  0x19   : > { %p169_p7 = scmp.lt.s32.totalorder (%p2700_p3), %s168_s30, 3  ;;  %s2727_s22 = scalar_lea.vmem (%p2700_p3), [#allocation2], %s1951_s29  }
  0x1a   : > { %s174_s5 = sadd.s32 (%p2700_p3), %s1952_s4, %s167_s28 }
  0x1b   : > { %s1898_s6 = sshll.u32 (%p2700_p3), %s174_s5, 3 }
  0x1c   : > { %s3746_s30 = smov (!%p169_p7, %s168_s30), 3  ;;  %s2723_s10 = scalar_lea.vmem %s3688_s0, %s1898_s6  }
  0x1d   : > { %s171_s7 = smul.u32 384, %s3746_s30  ;;  %s2725_s11 = sshll.u32 %s3746_s30, 3 }
  0x1f   : > { %p1900_p8 = scmp.eq.s32.totalorder %s171_s7, 0 }
  0x20   : > { %p181_p9 = scmp.lt.u32.totalorder (!%p1900_p8), %s2725_s11, 8 }
  0x21   : > { %180 = sbr.rel (%p1900_p8) target bundleno = 195 (0xc3), region = 24 }
  0x28   : > { %184 = sbr.rel (%p181_p9) target bundleno = 186 (0xba), region = 28  ;;  %s2731_s23 = sand.u32 (!%p181_p9), 7, %s2725_s11  }
  0x29   : > { %p204_p10 = scmp.eq.s32.totalorder (!%p181_p9), %s2731_s23, 0  ;;  %p1901_p11 = scmp.ne.s32.totalorder (!%p181_p9), %s2731_s23, 0 }
  0x2f   : > { %207 = sbr.rel (%p1901_p11) target bundleno = 113 (0x71), region = 43  ;;  %s208_s24 = sshrl.u32 (!%p1901_p11), %s2725_s11, 3 }
  0x30   : > { %2279 = sdivrem.u32 (!%p1901_p11), %s208_s24, 24 }
  0x39   : > { %s2738_s25 = spop.drf %2279 }
  0x3a   : > { %p1902_p12 = scmp.le.s32.totalorder %s2738_s25, 0 }
  0x3b   : > { %s3689_s27 = smov (!%p1902_p12), %s2727_s22  ;;  %s3690_s28 = smov (!%p1902_p12), %s2723_s10 }
  0x3c   : > { %1737 = sbr.rel (%p1902_p12) target bundleno = 84 (0x54), region = 253  ;;  %s2747_s29 = smov (!%p1902_p12), 0  }
  0x3d   : > { %s2749_s30 = smov (!%p1902_p12), 0  }
  0x43 LB: >> { %v238_v0 = vld [vmem:[%s2509_s28 + $0x40] sm:$0xff]  ;;  %v240_v1 = vld [vmem:[%s2509_s28 + $0x48] sm:$0xff]  ;;  %v242_v2 = vld [vmem:[%s2509_s28 + $0x50] sm:$0xff]  ;;  %s366_s4 = sadd.s32 1, %s2513_s29  ;;  %s216_s30 = sadd.s32 1, %s2517_s30   ;;  %s2517_s30 = sphi %s2749_s30, %s216_s30   ;;  %s2513_s29 = sphi %s2747_s29, %s3692_s29   ;;  %s2509_s28 = sphi %s3690_s28, %s371_s28   ;;  %s2505_s27 = sphi %s3689_s27, %s3691_s27  }
  0x44   : >> { %v244_v3 = vld [vmem:[%s2509_s28 + $0x58] sm:$0xff]  ;;  %v246_v4 = vld [vmem:[%s2509_s28 + $0x60] sm:$0xff]  ;;  %v248_v5 = vld [vmem:[%s2509_s28 + $0x68] sm:$0xff]  ;;  %319 = vst [vmem:[%s2505_s27 + $0x30] sm:$0xff] %v238_v0  ;;  %p367_p13 = scmp.ge.s32.totalorder %s366_s4, %s2738_s25  ;;  %p215_p0 = scmp.ge.s32.totalorder %s216_s30, %s2738_s25 }
  0x45   : >> { %321 = vst [vmem:[%s2505_s27 + $0x38] sm:$0xff] %v240_v1  ;;  %323 = vst [vmem:[%s2505_s27 + $0x40] sm:$0xff] %v242_v2  ;;  %v250_v6 = vld [vmem:[%s2509_s28 + $0x70] sm:$0xff]  ;;  %v252_v7 = vld [vmem:[%s2509_s28 + $0x78] sm:$0xff] }
  0x46   : >> { %v254_v8 = vld [vmem:[%s2509_s28 + $0x80] sm:$0xff]  ;;  %325 = vst [vmem:[%s2505_s27 + $0x48] sm:$0xff] %v244_v3  ;;  %327 = vst [vmem:[%s2505_s27 + $0x50] sm:$0xff] %v246_v4  ;;  %v256_v9 = vld [vmem:[%s2509_s28 + $0x88] sm:$0xff]  ;;  %s3748_s4 = smov (%p367_p13, %s366_s4), 0 }
  0x47   : >> { %329 = vst [vmem:[%s2505_s27 + $0x58] sm:$0xff] %v248_v5  ;;  %v258_v10 = vld [vmem:[%s2509_s28 + $0x90] sm:$0xff]  ;;  %v260_v11 = vld [vmem:[%s2509_s28 + $0x98] sm:$0xff]  ;;  %331 = vst [vmem:[%s2505_s27 + $0x60] sm:$0xff] %v250_v6  ;;  %s369_s5 = smul.u32 192, %s3748_s4  ;;  %s3692_s29 = smov %s3748_s4 }
  0x48   : >> { %333 = vst [vmem:[%s2505_s27 + $0x68] sm:$0xff] %v252_v7  ;;  %335 = vst [vmem:[%s2505_s27 + $0x70] sm:$0xff] %v254_v8  ;;  %v262_v12 = vld [vmem:[%s2509_s28 + $0xa0] sm:$0xff]  ;;  %v264_v13 = vld [vmem:[%s2509_s28 + $0xa8] sm:$0xff] }
  0x49   : >> { %v266_v14 = vld [vmem:[%s2509_s28 + $0xb0] sm:$0xff]  ;;  %337 = vst [vmem:[%s2505_s27 + $0x78] sm:$0xff] %v256_v9  ;;  %339 = vst [vmem:[%s2505_s27 + $0x80] sm:$0xff] %v258_v10  ;;  %v268_v15 = vld [vmem:[%s2509_s28 + $0xb8] sm:$0xff]  ;;  %s372_s6 = scalar_lea.vmem %s2727_s22, %s369_s5 [#allocation2]  }
  0x4a   : >> { %341 = vst [vmem:[%s2505_s27 + $0x88] sm:$0xff] %v260_v11  ;;  %v230_v16 = vld [vmem:[%s2509_s28 + $0x20] sm:$0xff]  ;;  %v232_v17 = vld [vmem:[%s2509_s28 + $0x28] sm:$0xff]  ;;  %343 = vst [vmem:[%s2505_s27 + $0x90] sm:$0xff] %v262_v12 }
  0x4b   : >> { %345 = vst [vmem:[%s2505_s27 + $0x98] sm:$0xff] %v264_v13  ;;  %347 = vst [vmem:[%s2505_s27 + $0xa0] sm:$0xff] %v266_v14  ;;  %v310_v18 = vld [vmem:[%s2509_s28 + $0xc0] sm:$0xff]  ;;  %v312_v19 = vld [vmem:[%s2509_s28 + $0xc8] sm:$0xff] }
  0x4c   : >> { %v314_v20 = vld [vmem:[%s2509_s28 + $0xd0] sm:$0xff]  ;;  %271 = vst [vmem:[%s2505_s27 + $0x18] sm:$0xff] %v230_v16  ;;  %273 = vst [vmem:[%s2505_s27 + $0x20] sm:$0xff] %v232_v17  ;;  %v316_v21 = vld [vmem:[%s2509_s28 + $0xd8] sm:$0xff] }
  0x4d   : >> { %349 = vst [vmem:[%s2505_s27 + $0xa8] sm:$0xff] %v268_v15  ;;  %v222_v22 = vld [vmem:[%s2509_s28] sm:$0xff]  ;;  %v224_v23 = vld [vmem:[%s2509_s28 + $0x8] sm:$0xff]  ;;  %351 = vst [vmem:[%s2505_s27 + $0xb0] sm:$0xff] %v310_v18  ;;  %218 = sbr.rel (!%p215_p0) target bundleno = 67 (0x43), region = 259 }
  0x4e   : >> { %353 = vst [vmem:[%s2505_s27 + $0xb8] sm:$0xff] %v312_v19  ;;  %355 = vst [vmem:[%s2505_s27 + $0xc0] sm:$0xff] %v314_v20  ;;  %v226_v24 = vld [vmem:[%s2509_s28 + $0x10] sm:$0xff]  ;;  %v358_v26 = vld [vmem:[%s2509_s28 + $0xe0] sm:$0xff] }
  0x4f   : >> { %223 = vst [vmem:[%s2505_s27] sm:$0xff] %v222_v22  ;;  %225 = vst [vmem:[%s2505_s27 + $0x8] sm:$0xff] %v224_v23  ;;  %v274_v25 = vld [vmem:[%s2509_s28 + $0x30] sm:$0xff]  ;;  %v360_v27 = vld [vmem:[%s2509_s28 + $0xe8] sm:$0xff] }
  0x50   : >> { %357 = vst [vmem:[%s2505_s27 + $0xc8] sm:$0xff] %v316_v21  ;;  %227 = vst [vmem:[%s2505_s27 + $0x10] sm:$0xff] %v226_v24  ;;  %v362_v28 = vld [vmem:[%s2509_s28 + $0xf0] sm:$0xff]  ;;  %v364_v29 = vld [vmem:[%s2509_s28 + $0xf8] sm:$0xff]  ;;  %s371_s28 = scalar_lea.vmem %s2723_s10, %s369_s5  }
  0x51   : >> { %275 = vst [vmem:[%s2505_s27 + $0x28] sm:$0xff] %v274_v25  ;;  %359 = vst [vmem:[%s2505_s27 + $0xd0] sm:$0xff] %v358_v26 }
  0x52   : >> { %361 = vst [vmem:[%s2505_s27 + $0xd8] sm:$0xff] %v360_v27  ;;  %363 = vst [vmem:[%s2505_s27 + $0xe0] sm:$0xff] %v362_v28 }
  0x53   : >> { %365 = vst [vmem:[%s2505_s27 + $0xe8] sm:$0xff] %v364_v29  ;;  %s3691_s27 = smov %s372_s6 }
  0x54 PF: > { %2281 = sdivrem.u32 %s208_s24, 24 }
  0x55   : > { %s1903_s7 = smul.u32 3072, %s2738_s25 }
  0x57   : > { %s377_s8 = sshra.s32 %s1903_s7, 4 }
  0x58   : > { %s2845_s9 = scalar_lea.vmem %s2723_s10, %s377_s8   ;;  %s2848_s5 = scalar_lea.vmem %s2727_s22, %s377_s8 [#allocation2]  }
  0x5d   : > { %s2850_s6 = spop.drf %2281 }
  0x5e   : > { %p1905_p1 = scmp.le.s32.totalorder %s2850_s6, 0 }
  0x5f   : > { %s3693_s27 = smov (!%p1905_p1), %s2848_s5  ;;  %s2523_s28 = smov (!%p1905_p1), %s2845_s9  }
  0x60   : > { %1751 = sbr.rel (%p1905_p1) target bundleno = 113 (0x71), region = 264  ;;  %s2527_s29 = smov (!%p1905_p1), 0  }
  0x61   : > { %s2531_s30 = smov (!%p1905_p1), 0  }
  0x67 LB: >> { %v393_v30 = vld [vmem:[%s2525_s28] sm:$0xff]  ;;  %s399_s24 = sadd.s32 1, %s2529_s29  ;;  %s387_s30 = sadd.s32 1, %s2533_s30   ;;  %s2533_s30 = sphi %s2531_s30, %s387_s30   ;;  %s2529_s29 = sphi %s2527_s29, %s2528_s29   ;;  %s2525_s28 = sphi %s2523_s28, %s404_s28   ;;  %s2521_s27 = sphi %s3693_s27, %s405_s27  }
  0x68   : >> { %v395_v31 = vld [vmem:[%s2525_s28 + $0x20] sm:$0xff]  ;;  %394 = vst [vmem:[%s2521_s27] sm:$0xff] %v393_v30  ;;  %p400_p2 = scmp.ge.s32.totalorder %s399_s24, %s2850_s6  ;;  %p386_p4 = scmp.ge.s32.totalorder %s387_s30, %s2850_s6 }
  0x69   : >> { %v397_v32 = vld [vmem:[%s2525_s28 + $0x40] sm:$0xff]  ;;  %396 = vst [vmem:[%s2521_s27 + $0x18] sm:$0xff] %v395_v31 }
  0x6a   : >> { %398 = vst [vmem:[%s2521_s27 + $0x30] sm:$0xff] %v397_v32  ;;  %s3750_s24 = smov (%p400_p2, %s399_s24), 0  ;;  %389 = sbr.rel (!%p386_p4) target bundleno = 103 (0x67), region = 270 }
  0x6b   : >> { %s1906_s25 = sshll.u32 %s3750_s24, 3  ;;  %s2528_s29 = smov %s3750_s24  }
  0x6c   : >> { %s404_s28 = scalar_lea.vmem %s2845_s9, %s1906_s25   ;;  %s405_s27 = scalar_lea.vmem %s2848_s5, %s1906_s25 [#allocation2]  }
  0x71 PF: > { %408 = sbr.rel (%p204_p10) target bundleno = 186 (0xba), region = 61  ;;  %s410_s4 = ssub.s32 (!%p204_p10), %s2725_s11, %s2731_s23 }
  0x72   : > { %s414_s7 = sshrl.u32 (!%p204_p10), %s2725_s11, 3  ;;  %s2870_s8 = scalar_lea.vmem (!%p204_p10), %s2723_s10, %s410_s4 }
  0x73   : > { %s2873_s27 = scalar_lea.vmem (!%p204_p10), %s2727_s22, %s410_s4 [#allocation2]  ;;  %2283 = sdivrem.u32 (!%p204_p10), %s414_s7, 24 }
  0x7c   : > { %s2877_s28 = spop.drf %2283 }
  0x7d   : > { %p1908_p5 = scmp.le.s32.totalorder %s2877_s28, 0 }
  0x7e   : > { %s3694_s9 = smov (!%p1908_p5), %s2727_s22  ;;  %s3695_s5 = smov (!%p1908_p5), %s2723_s10 }
  0x7f   : > { %1765 = sbr.rel (%p1908_p5) target bundleno = 151 (0x97), region = 275  ;;  %s2886_s6 = smov (!%p1908_p5), 0  }
  0x80   : > { %s2888_s29 = smov (!%p1908_p5), 0  }
  0x86 LB: >> { %v444_v33 = vld [vmem:[%s2541_s5 + $0x40] sm:$0xff]  ;;  %v446_v34 = vld [vmem:[%s2541_s5 + $0x48] sm:$0xff]  ;;  %v448_v35 = vld [vmem:[%s2541_s5 + $0x50] sm:$0xff]  ;;  %s572_s30 = sadd.s32 1, %s2545_s6  ;;  %s422_s29 = sadd.s32 1, %s2549_s29   ;;  %s2549_s29 = sphi %s2888_s29, %s422_s29   ;;  %s2545_s6 = sphi %s2886_s6, %s3697_s6   ;;  %s2541_s5 = sphi %s3695_s5, %s577_s5   ;;  %s2537_s9 = sphi %s3694_s9, %s3696_s9  }
  0x87   : >> { %v450_v36 = vld [vmem:[%s2541_s5 + $0x58] sm:$0xff]  ;;  %v452_v37 = vld [vmem:[%s2541_s5 + $0x60] sm:$0xff]  ;;  %v454_v38 = vld [vmem:[%s2541_s5 + $0x68] sm:$0xff]  ;;  %525 = vst [vmem:[%s2537_s9 + $0x30] sm:$0xff] %v444_v33  ;;  %p573_p6 = scmp.ge.s32.totalorder %s572_s30, %s2877_s28  ;;  %p421_p7 = scmp.ge.s32.totalorder %s422_s29, %s2877_s28 }
  0x88   : >> { %527 = vst [vmem:[%s2537_s9 + $0x38] sm:$0xff] %v446_v34  ;;  %529 = vst [vmem:[%s2537_s9 + $0x40] sm:$0xff] %v448_v35  ;;  %v456_v39 = vld [vmem:[%s2541_s5 + $0x70] sm:$0xff]  ;;  %v458_v40 = vld [vmem:[%s2541_s5 + $0x78] sm:$0xff] }
  0x89   : >> { %v460_v41 = vld [vmem:[%s2541_s5 + $0x80] sm:$0xff]  ;;  %531 = vst [vmem:[%s2537_s9 + $0x48] sm:$0xff] %v450_v36  ;;  %533 = vst [vmem:[%s2537_s9 + $0x50] sm:$0xff] %v452_v37  ;;  %v462_v42 = vld [vmem:[%s2541_s5 + $0x88] sm:$0xff]  ;;  %s3752_s30 = smov (%p573_p6, %s572_s30), 0 }
  0x8a   : >> { %535 = vst [vmem:[%s2537_s9 + $0x58] sm:$0xff] %v454_v38  ;;  %v464_v43 = vld [vmem:[%s2541_s5 + $0x90] sm:$0xff]  ;;  %v466_v44 = vld [vmem:[%s2541_s5 + $0x98] sm:$0xff]  ;;  %537 = vst [vmem:[%s2537_s9 + $0x60] sm:$0xff] %v456_v39  ;;  %s575_s24 = smul.u32 192, %s3752_s30  ;;  %s3697_s6 = smov %s3752_s30 }
  0x8b   : >> { %539 = vst [vmem:[%s2537_s9 + $0x68] sm:$0xff] %v458_v40  ;;  %541 = vst [vmem:[%s2537_s9 + $0x70] sm:$0xff] %v460_v41  ;;  %v468_v45 = vld [vmem:[%s2541_s5 + $0xa0] sm:$0xff]  ;;  %v470_v46 = vld [vmem:[%s2541_s5 + $0xa8] sm:$0xff] }
  0x8c   : >> { %v472_v47 = vld [vmem:[%s2541_s5 + $0xb0] sm:$0xff]  ;;  %543 = vst [vmem:[%s2537_s9 + $0x78] sm:$0xff] %v462_v42  ;;  %545 = vst [vmem:[%s2537_s9 + $0x80] sm:$0xff] %v464_v43  ;;  %v474_v48 = vld [vmem:[%s2541_s5 + $0xb8] sm:$0xff]  ;;  %s578_s25 = scalar_lea.vmem %s2727_s22, %s575_s24 [#allocation2]  }
  0x8d   : >> { %547 = vst [vmem:[%s2537_s9 + $0x88] sm:$0xff] %v466_v44  ;;  %v436_v49 = vld [vmem:[%s2541_s5 + $0x20] sm:$0xff]  ;;  %v438_v50 = vld [vmem:[%s2541_s5 + $0x28] sm:$0xff]  ;;  %549 = vst [vmem:[%s2537_s9 + $0x90] sm:$0xff] %v468_v45 }
  0x8e   : >> { %551 = vst [vmem:[%s2537_s9 + $0x98] sm:$0xff] %v470_v46  ;;  %553 = vst [vmem:[%s2537_s9 + $0xa0] sm:$0xff] %v472_v47  ;;  %v516_v51 = vld [vmem:[%s2541_s5 + $0xc0] sm:$0xff]  ;;  %v518_v52 = vld [vmem:[%s2541_s5 + $0xc8] sm:$0xff] }
  0x8f   : >> { %v520_v53 = vld [vmem:[%s2541_s5 + $0xd0] sm:$0xff]  ;;  %477 = vst [vmem:[%s2537_s9 + $0x18] sm:$0xff] %v436_v49  ;;  %479 = vst [vmem:[%s2537_s9 + $0x20] sm:$0xff] %v438_v50  ;;  %v522_v54 = vld [vmem:[%s2541_s5 + $0xd8] sm:$0xff] }
  0x90   : >> { %555 = vst [vmem:[%s2537_s9 + $0xa8] sm:$0xff] %v474_v48  ;;  %v428_v55 = vld [vmem:[%s2541_s5] sm:$0xff]  ;;  %v430_v56 = vld [vmem:[%s2541_s5 + $0x8] sm:$0xff]  ;;  %557 = vst [vmem:[%s2537_s9 + $0xb0] sm:$0xff] %v516_v51  ;;  %424 = sbr.rel (!%p421_p7) target bundleno = 134 (0x86), region = 281 }
  0x91   : >> { %559 = vst [vmem:[%s2537_s9 + $0xb8] sm:$0xff] %v518_v52  ;;  %561 = vst [vmem:[%s2537_s9 + $0xc0] sm:$0xff] %v520_v53  ;;  %v432_v57 = vld [vmem:[%s2541_s5 + $0x10] sm:$0xff]  ;;  %v564_v59 = vld [vmem:[%s2541_s5 + $0xe0] sm:$0xff] }
  0x92   : >> { %429 = vst [vmem:[%s2537_s9] sm:$0xff] %v428_v55  ;;  %431 = vst [vmem:[%s2537_s9 + $0x8] sm:$0xff] %v430_v56  ;;  %v480_v58 = vld [vmem:[%s2541_s5 + $0x30] sm:$0xff]  ;;  %v566_v60 = vld [vmem:[%s2541_s5 + $0xe8] sm:$0xff] }
  0x93   : >> { %563 = vst [vmem:[%s2537_s9 + $0xc8] sm:$0xff] %v522_v54  ;;  %433 = vst [vmem:[%s2537_s9 + $0x10] sm:$0xff] %v432_v57  ;;  %v568_v61 = vld [vmem:[%s2541_s5 + $0xf0] sm:$0xff]  ;;  %v570_v62 = vld [vmem:[%s2541_s5 + $0xf8] sm:$0xff]  ;;  %s577_s5 = scalar_lea.vmem %s2723_s10, %s575_s24  }
  0x94   : >> { %481 = vst [vmem:[%s2537_s9 + $0x28] sm:$0xff] %v480_v58  ;;  %565 = vst [vmem:[%s2537_s9 + $0xd0] sm:$0xff] %v564_v59 }
  0x95   : >> { %567 = vst [vmem:[%s2537_s9 + $0xd8] sm:$0xff] %v566_v60  ;;  %569 = vst [vmem:[%s2537_s9 + $0xe0] sm:$0xff] %v568_v61 }
  0x96   : >> { %571 = vst [vmem:[%s2537_s9 + $0xe8] sm:$0xff] %v570_v62  ;;  %s3696_s9 = smov %s578_s25 }
  0x97 PF: > { %2285 = sdivrem.u32 %s414_s7, 24 }
  0x98   : > { %s1909_s4 = smul.u32 3072, %s2877_s28 }
  0x9a   : > { %s583_s24 = sshra.s32 %s1909_s4, 4 }
  0x9b   : > { %s2984_s0 = scalar_lea.vmem %s2723_s10, %s583_s24   ;;  %s2987_s20 = scalar_lea.vmem %s2727_s22, %s583_s24 [#allocation2]  }
  0xa0   : > { %s2989_s25 = spop.drf %2285 }
  0xa1   : > { %p1911_p8 = scmp.le.s32.totalorder %s2989_s25, 0 }
  0xa2   : > { %s3698_s9 = smov (!%p1911_p8), %s2987_s20  ;;  %s2555_s5 = smov (!%p1911_p8), %s2984_s0  }
  0xa3   : > { %1779 = sbr.rel (%p1911_p8) target bundleno = 180 (0xb4), region = 286  ;;  %s2559_s6 = smov (!%p1911_p8), 0  }
  0xa4   : > { %s2563_s29 = smov (!%p1911_p8), 0  }
  0xaa LB: >> { %v599_v63 = vld [vmem:[%s2557_s5] sm:$0xff]  ;;  %s605_s7 = sadd.s32 1, %s2561_s6  ;;  %s593_s29 = sadd.s32 1, %s2565_s29   ;;  %s2565_s29 = sphi %s2563_s29, %s593_s29   ;;  %s2561_s6 = sphi %s2559_s6, %s2560_s6   ;;  %s2557_s5 = sphi %s2555_s5, %s610_s5   ;;  %s2553_s9 = sphi %s3698_s9, %s611_s9  }
  0xab   : >> { %v601_v0 = vld [vmem:[%s2557_s5 + $0x20] sm:$0xff]  ;;  %600 = vst [vmem:[%s2553_s9] sm:$0xff] %v599_v63  ;;  %p606_p9 = scmp.ge.s32.totalorder %s605_s7, %s2989_s25  ;;  %p592_p10 = scmp.ge.s32.totalorder %s593_s29, %s2989_s25 }
  0xac   : >> { %v603_v1 = vld [vmem:[%s2557_s5 + $0x40] sm:$0xff]  ;;  %602 = vst [vmem:[%s2553_s9 + $0x18] sm:$0xff] %v601_v0 }
  0xad   : >> { %604 = vst [vmem:[%s2553_s9 + $0x30] sm:$0xff] %v603_v1  ;;  %s3754_s7 = smov (%p606_p9, %s605_s7), 0  ;;  %595 = sbr.rel (!%p592_p10) target bundleno = 170 (0xaa), region = 292 }
  0xae   : >> { %s1912_s28 = sshll.u32 %s3754_s7, 3  ;;  %s2560_s6 = smov %s3754_s7  }
  0xaf   : >> { %s610_s5 = scalar_lea.vmem %s2984_s0, %s1912_s28   ;;  %s611_s9 = scalar_lea.vmem %s2987_s20, %s1912_s28 [#allocation2]  }
  0xb4 PF: > { %s2631_s30 = smov 0  }
  0xb5   : > { %s612_s4 = sshllo.u32 %s2631_s30, %s2731_s23 }
  0xb6   : > { %v621_v2 = vld [vmem:[%s2870_s8] sm:%s612_s4] }
  0xb7   : > { %v623_v3 = vld [vmem:[%s2870_s8 + $0x20] sm:%s612_s4]  ;;  %622 = vst [vmem:[%s2873_s27] sm:%s612_s4] %v621_v2 }
  0xb8   : > { %624 = vst [vmem:[%s2873_s27 + $0x18] sm:%s612_s4] %v623_v3  ;;  %v625_v4 = vld [vmem:[%s2870_s8 + $0x40] sm:%s612_s4] }
  0xb9   : > { %626 = vst [vmem:[%s2873_s27 + $0x30] sm:%s612_s4] %v625_v4 }
  0xba PF: > { %p1914_p11 = scmp.ge.u32.totalorder %s2725_s11, 8 }
  0xbb   : > { %s2632_s0 = smov (!%p1914_p11), 0  }
  0xbc   : > { %187 = sbr.rel (%p1914_p11) target bundleno = 195 (0xc3), region = 32  ;;  %s188_s20 = sshllo.u32 (!%p1914_p11), %s2632_s0, %s2725_s11 }
  0xbd   : > { %v197_v5 = vld [vmem:[%s2723_s10] sm:%s188_s20] (!%p1914_p11) }
  0xbe   : > { %v199_v6 = vld [vmem:[%s2723_s10 + $0x20] sm:%s188_s20] (!%p1914_p11)  ;;  %198 = vst [vmem:[%s2727_s22] sm:%s188_s20] (!%p1914_p11), %v197_v5 }
  0xbf   : > { %200 = vst [vmem:[%s2727_s22 + $0x18] sm:%s188_s20] (!%p1914_p11), %v199_v6  ;;  %v201_v7 = vld [vmem:[%s2723_s10 + $0x40] sm:%s188_s20] (!%p1914_p11) }
  0xc0   : > { %202 = vst [vmem:[%s2727_s22 + $0x30] sm:%s188_s20] (!%p1914_p11), %v201_v7 }
  0xc3 PF: > { %630 = sbr.rel (!%p2700_p3) target bundleno = 369 (0x171), region = 86  ;;  %s632_s23 = sand.u32 (%p2700_p3), 1, %s2481_s13  }
  0xc4   : > { %s635_s8 = smul.u32 (%p2700_p3), 3, %s2493_s16 }
  0xc5   : > { %s1953_s27 = smul.u32 (%p2700_p3), 72, %s632_s23 }
  0xc6   : > { %s636_s24 = ssub.s32 (%p2700_p3), 4, %s635_s8  ;;  %s1954_s11 = smul.u32 (%p2700_p3), 12, %s2497_s17 }
  0xc7   : > { %p637_p12 = scmp.lt.s32.totalorder (%p2700_p3), %s636_s24, 3  ;;  %s3030_s29 = scalar_lea.vmem (%p2700_p3), [#allocation3], %s1953_s27  }
  0xc8   : > { %s642_s25 = sadd.s32 (%p2700_p3), %s1954_s11, %s635_s8 }
  0xc9   : > { %s1916_s9 = sshll.u32 (%p2700_p3), %s642_s25, 3 }
  0xca   : > { %s3756_s24 = smov (!%p637_p12, %s636_s24), 3  ;;  %s3026_s6 = scalar_lea.vmem %s3680_s1, %s1916_s9  }
  0xcb   : > { %s639_s10 = smul.u32 384, %s3756_s24  ;;  %s3028_s21 = sshll.u32 %s3756_s24, 3 }
  0xcd   : > { %p1918_p3 = scmp.eq.s32.totalorder %s639_s10, 0 }
  0xce   : > { %p649_p13 = scmp.lt.u32.totalorder (!%p1918_p3), %s3028_s21, 8 }
  0xcf   : > { %648 = sbr.rel (%p1918_p3) target bundleno = 369 (0x171), region = 90 }
  0xd6   : > { %652 = sbr.rel (%p649_p13) target bundleno = 360 (0x168), region = 94  ;;  %s3034_s7 = sand.u32 (!%p649_p13), 7, %s3028_s21  }
  0xd7   : > { %p672_p0 = scmp.eq.s32.totalorder (!%p649_p13), %s3034_s7, 0  ;;  %p1919_p1 = scmp.ne.s32.totalorder (!%p649_p13), %s3034_s7, 0 }
  0xdd   : > { %675 = sbr.rel (%p1919_p1) target bundleno = 287 (0x11f), region = 109  ;;  %s676_s28 = sshrl.u32 (!%p1919_p1), %s3028_s21, 3 }
  0xde   : > { %2287 = sdivrem.u32 (!%p1919_p1), %s676_s28, 24 }
  0xe7   : > { %s3041_s30 = spop.drf %2287 }
  0xe8   : > { %p1920_p2 = scmp.le.s32.totalorder %s3041_s30, 0 }
  0xe9   : > { %s3699_s4 = smov (!%p1920_p2), %s3030_s29  ;;  %s3700_s0 = smov (!%p1920_p2), %s3026_s6 }
  0xea   : > { %1793 = sbr.rel (%p1920_p2) target bundleno = 258 (0x102), region = 297  ;;  %s3050_s20 = smov (!%p1920_p2), 0  }
  0xeb   : > { %s3052_s23 = smov (!%p1920_p2), 0  }
  0xf1 LB: >> { %v706_v8 = vld [vmem:[%s2573_s0 + $0x40] sm:$0xff]  ;;  %v708_v9 = vld [vmem:[%s2573_s0 + $0x48] sm:$0xff]  ;;  %v710_v10 = vld [vmem:[%s2573_s0 + $0x50] sm:$0xff]  ;;  %s834_s8 = sadd.s32 1, %s2577_s20  ;;  %s684_s23 = sadd.s32 1, %s2581_s23   ;;  %s2581_s23 = sphi %s3052_s23, %s684_s23   ;;  %s2577_s20 = sphi %s3050_s20, %s3702_s20   ;;  %s2573_s0 = sphi %s3700_s0, %s839_s0   ;;  %s2569_s4 = sphi %s3699_s4, %s3701_s4  }
  0xf2   : >> { %v712_v11 = vld [vmem:[%s2573_s0 + $0x58] sm:$0xff]  ;;  %v714_v12 = vld [vmem:[%s2573_s0 + $0x60] sm:$0xff]  ;;  %v716_v13 = vld [vmem:[%s2573_s0 + $0x68] sm:$0xff]  ;;  %787 = vst [vmem:[%s2569_s4 + $0x30] sm:$0xff] %v706_v8  ;;  %p835_p4 = scmp.ge.s32.totalorder %s834_s8, %s3041_s30  ;;  %p683_p5 = scmp.ge.s32.totalorder %s684_s23, %s3041_s30 }
  0xf3   : >> { %789 = vst [vmem:[%s2569_s4 + $0x38] sm:$0xff] %v708_v9  ;;  %791 = vst [vmem:[%s2569_s4 + $0x40] sm:$0xff] %v710_v10  ;;  %v718_v14 = vld [vmem:[%s2573_s0 + $0x70] sm:$0xff]  ;;  %v720_v15 = vld [vmem:[%s2573_s0 + $0x78] sm:$0xff] }
  0xf4   : >> { %v722_v16 = vld [vmem:[%s2573_s0 + $0x80] sm:$0xff]  ;;  %793 = vst [vmem:[%s2569_s4 + $0x48] sm:$0xff] %v712_v11  ;;  %795 = vst [vmem:[%s2569_s4 + $0x50] sm:$0xff] %v714_v12  ;;  %v724_v17 = vld [vmem:[%s2573_s0 + $0x88] sm:$0xff]  ;;  %s3758_s8 = smov (%p835_p4, %s834_s8), 0 }
  0xf5   : >> { %797 = vst [vmem:[%s2569_s4 + $0x58] sm:$0xff] %v716_v13  ;;  %v726_v18 = vld [vmem:[%s2573_s0 + $0x90] sm:$0xff]  ;;  %v728_v19 = vld [vmem:[%s2573_s0 + $0x98] sm:$0xff]  ;;  %799 = vst [vmem:[%s2569_s4 + $0x60] sm:$0xff] %v718_v14  ;;  %s837_s27 = smul.u32 192, %s3758_s8  ;;  %s3702_s20 = smov %s3758_s8 }
  0xf6   : >> { %801 = vst [vmem:[%s2569_s4 + $0x68] sm:$0xff] %v720_v15  ;;  %803 = vst [vmem:[%s2569_s4 + $0x70] sm:$0xff] %v722_v16  ;;  %v730_v20 = vld [vmem:[%s2573_s0 + $0xa0] sm:$0xff]  ;;  %v732_v21 = vld [vmem:[%s2573_s0 + $0xa8] sm:$0xff] }
  0xf7   : >> { %v734_v22 = vld [vmem:[%s2573_s0 + $0xb0] sm:$0xff]  ;;  %805 = vst [vmem:[%s2569_s4 + $0x78] sm:$0xff] %v724_v17  ;;  %807 = vst [vmem:[%s2569_s4 + $0x80] sm:$0xff] %v726_v18  ;;  %v736_v23 = vld [vmem:[%s2573_s0 + $0xb8] sm:$0xff]  ;;  %s840_s24 = scalar_lea.vmem %s3030_s29, %s837_s27 [#allocation3]  }
  0xf8   : >> { %809 = vst [vmem:[%s2569_s4 + $0x88] sm:$0xff] %v728_v19  ;;  %v698_v24 = vld [vmem:[%s2573_s0 + $0x20] sm:$0xff]  ;;  %v700_v25 = vld [vmem:[%s2573_s0 + $0x28] sm:$0xff]  ;;  %811 = vst [vmem:[%s2569_s4 + $0x90] sm:$0xff] %v730_v20 }
  0xf9   : >> { %813 = vst [vmem:[%s2569_s4 + $0x98] sm:$0xff] %v732_v21  ;;  %815 = vst [vmem:[%s2569_s4 + $0xa0] sm:$0xff] %v734_v22  ;;  %v778_v26 = vld [vmem:[%s2573_s0 + $0xc0] sm:$0xff]  ;;  %v780_v27 = vld [vmem:[%s2573_s0 + $0xc8] sm:$0xff] }
  0xfa   : >> { %v782_v28 = vld [vmem:[%s2573_s0 + $0xd0] sm:$0xff]  ;;  %739 = vst [vmem:[%s2569_s4 + $0x18] sm:$0xff] %v698_v24  ;;  %741 = vst [vmem:[%s2569_s4 + $0x20] sm:$0xff] %v700_v25  ;;  %v784_v29 = vld [vmem:[%s2573_s0 + $0xd8] sm:$0xff] }
  0xfb   : >> { %817 = vst [vmem:[%s2569_s4 + $0xa8] sm:$0xff] %v736_v23  ;;  %v690_v30 = vld [vmem:[%s2573_s0] sm:$0xff]  ;;  %v692_v31 = vld [vmem:[%s2573_s0 + $0x8] sm:$0xff]  ;;  %819 = vst [vmem:[%s2569_s4 + $0xb0] sm:$0xff] %v778_v26  ;;  %686 = sbr.rel (!%p683_p5) target bundleno = 241 (0xf1), region = 303 }
  0xfc   : >> { %821 = vst [vmem:[%s2569_s4 + $0xb8] sm:$0xff] %v780_v27  ;;  %823 = vst [vmem:[%s2569_s4 + $0xc0] sm:$0xff] %v782_v28  ;;  %v694_v32 = vld [vmem:[%s2573_s0 + $0x10] sm:$0xff]  ;;  %v826_v34 = vld [vmem:[%s2573_s0 + $0xe0] sm:$0xff] }
  0xfd   : >> { %691 = vst [vmem:[%s2569_s4] sm:$0xff] %v690_v30  ;;  %693 = vst [vmem:[%s2569_s4 + $0x8] sm:$0xff] %v692_v31  ;;  %v742_v33 = vld [vmem:[%s2573_s0 + $0x30] sm:$0xff]  ;;  %v828_v35 = vld [vmem:[%s2573_s0 + $0xe8] sm:$0xff] }
  0xfe   : >> { %825 = vst [vmem:[%s2569_s4 + $0xc8] sm:$0xff] %v784_v29  ;;  %695 = vst [vmem:[%s2569_s4 + $0x10] sm:$0xff] %v694_v32  ;;  %v830_v36 = vld [vmem:[%s2573_s0 + $0xf0] sm:$0xff]  ;;  %v832_v37 = vld [vmem:[%s2573_s0 + $0xf8] sm:$0xff]  ;;  %s839_s0 = scalar_lea.vmem %s3026_s6, %s837_s27  }
  0xff   : >> { %743 = vst [vmem:[%s2569_s4 + $0x28] sm:$0xff] %v742_v33  ;;  %827 = vst [vmem:[%s2569_s4 + $0xd0] sm:$0xff] %v826_v34 }
 0x100   : >> { %829 = vst [vmem:[%s2569_s4 + $0xd8] sm:$0xff] %v828_v35  ;;  %831 = vst [vmem:[%s2569_s4 + $0xe0] sm:$0xff] %v830_v36 }
 0x101   : >> { %833 = vst [vmem:[%s2569_s4 + $0xe8] sm:$0xff] %v832_v37  ;;  %s3701_s4 = smov %s840_s24 }
 0x102 PF: > { %2289 = sdivrem.u32 %s676_s28, 24 }
 0x103   : > { %s1921_s11 = smul.u32 3072, %s3041_s30 }
 0x105   : > { %s845_s25 = sshra.s32 %s1921_s11, 4 }
 0x106   : > { %s3148_s9 = scalar_lea.vmem %s3026_s6, %s845_s25   ;;  %s3151_s10 = scalar_lea.vmem %s3030_s29, %s845_s25 [#allocation3]  }
 0x10b   : > { %s3153_s22 = spop.drf %2289 }
 0x10c   : > { %p1923_p6 = scmp.le.s32.totalorder %s3153_s22, 0 }
 0x10d   : > { %s3703_s5 = smov (!%p1923_p6), %s3151_s10  ;;  %s2587_s4 = smov (!%p1923_p6), %s3148_s9  }
 0x10e   : > { %1807 = sbr.rel (%p1923_p6) target bundleno = 287 (0x11f), region = 308  ;;  %s2591_s0 = smov (!%p1923_p6), 0  }
 0x10f   : > { %s2595_s20 = smov (!%p1923_p6), 0  }
 0x115 LB: >> { %v861_v38 = vld [vmem:[%s2589_s4] sm:$0xff]  ;;  %s867_s28 = sadd.s32 1, %s2593_s0  ;;  %s855_s20 = sadd.s32 1, %s2597_s20   ;;  %s2597_s20 = sphi %s2595_s20, %s855_s20   ;;  %s2593_s0 = sphi %s2591_s0, %s2592_s0   ;;  %s2589_s4 = sphi %s2587_s4, %s872_s4   ;;  %s2585_s5 = sphi %s3703_s5, %s873_s5  }
 0x116   : >> { %v863_v39 = vld [vmem:[%s2589_s4 + $0x20] sm:$0xff]  ;;  %862 = vst [vmem:[%s2585_s5] sm:$0xff] %v861_v38  ;;  %p868_p7 = scmp.ge.s32.totalorder %s867_s28, %s3153_s22  ;;  %p854_p8 = scmp.ge.s32.totalorder %s855_s20, %s3153_s22 }
 0x117   : >> { %v865_v40 = vld [vmem:[%s2589_s4 + $0x40] sm:$0xff]  ;;  %864 = vst [vmem:[%s2585_s5 + $0x18] sm:$0xff] %v863_v39 }
 0x118   : >> { %866 = vst [vmem:[%s2585_s5 + $0x30] sm:$0xff] %v865_v40  ;;  %s3760_s28 = smov (%p868_p7, %s867_s28), 0  ;;  %857 = sbr.rel (!%p854_p8) target bundleno = 277 (0x115), region = 314 }
 0x119   : >> { %s1924_s30 = sshll.u32 %s3760_s28, 3  ;;  %s2592_s0 = smov %s3760_s28  }
 0x11a   : >> { %s872_s4 = scalar_lea.vmem %s3148_s9, %s1924_s30   ;;  %s873_s5 = scalar_lea.vmem %s3151_s10, %s1924_s30 [#allocation3]  }
 0x11f PF: > { %876 = sbr.rel (%p672_p0) target bundleno = 360 (0x168), region = 127  ;;  %s878_s23 = ssub.s32 (!%p672_p0), %s3028_s21, %s3034_s7 }
 0x120   : > { %s882_s8 = sshrl.u32 (!%p672_p0), %s3028_s21, 3  ;;  %s3173_s27 = scalar_lea.vmem (!%p672_p0), %s3026_s6, %s878_s23 }
 0x121   : > { %s3176_s24 = scalar_lea.vmem (!%p672_p0), %s3030_s29, %s878_s23 [#allocation3]  ;;  %2291 = sdivrem.u32 (!%p672_p0), %s882_s8, 24 }
 0x12a   : > { %s3180_s11 = spop.drf %2291 }
 0x12b   : > { %p1926_p9 = scmp.le.s32.totalorder %s3180_s11, 0 }
 0x12c   : > { %s3704_s25 = smov (!%p1926_p9), %s3030_s29  ;;  %s3705_s9 = smov (!%p1926_p9), %s3026_s6 }
 0x12d   : > { %1821 = sbr.rel (%p1926_p9) target bundleno = 325 (0x145), region = 319  ;;  %s3189_s10 = smov (!%p1926_p9), 0  }
 0x12e   : > { %s3191_s22 = smov (!%p1926_p9), 0  }
 0x134 LB: >> { %v912_v41 = vld [vmem:[%s2605_s9 + $0x40] sm:$0xff]  ;;  %v914_v42 = vld [vmem:[%s2605_s9 + $0x48] sm:$0xff]  ;;  %v916_v43 = vld [vmem:[%s2605_s9 + $0x50] sm:$0xff]  ;;  %s1040_s5 = sadd.s32 1, %s2609_s10  ;;  %s890_s22 = sadd.s32 1, %s2613_s22   ;;  %s2613_s22 = sphi %s3191_s22, %s890_s22   ;;  %s2609_s10 = sphi %s3189_s10, %s3707_s10   ;;  %s2605_s9 = sphi %s3705_s9, %s1045_s9   ;;  %s2601_s25 = sphi %s3704_s25, %s3706_s25  }
 0x135   : >> { %v918_v44 = vld [vmem:[%s2605_s9 + $0x58] sm:$0xff]  ;;  %v920_v45 = vld [vmem:[%s2605_s9 + $0x60] sm:$0xff]  ;;  %v922_v46 = vld [vmem:[%s2605_s9 + $0x68] sm:$0xff]  ;;  %993 = vst [vmem:[%s2601_s25 + $0x30] sm:$0xff] %v912_v41  ;;  %p1041_p10 = scmp.ge.s32.totalorder %s1040_s5, %s3180_s11  ;;  %p889_p11 = scmp.ge.s32.totalorder %s890_s22, %s3180_s11 }
 0x136   : >> { %995 = vst [vmem:[%s2601_s25 + $0x38] sm:$0xff] %v914_v42  ;;  %997 = vst [vmem:[%s2601_s25 + $0x40] sm:$0xff] %v916_v43  ;;  %v924_v47 = vld [vmem:[%s2605_s9 + $0x70] sm:$0xff]  ;;  %v926_v48 = vld [vmem:[%s2605_s9 + $0x78] sm:$0xff] }
 0x137   : >> { %v928_v49 = vld [vmem:[%s2605_s9 + $0x80] sm:$0xff]  ;;  %999 = vst [vmem:[%s2601_s25 + $0x48] sm:$0xff] %v918_v44  ;;  %1001 = vst [vmem:[%s2601_s25 + $0x50] sm:$0xff] %v920_v45  ;;  %v930_v50 = vld [vmem:[%s2605_s9 + $0x88] sm:$0xff]  ;;  %s3762_s5 = smov (%p1041_p10, %s1040_s5), 0 }
 0x138   : >> { %1003 = vst [vmem:[%s2601_s25 + $0x58] sm:$0xff] %v922_v46  ;;  %v932_v51 = vld [vmem:[%s2605_s9 + $0x90] sm:$0xff]  ;;  %v934_v52 = vld [vmem:[%s2605_s9 + $0x98] sm:$0xff]  ;;  %1005 = vst [vmem:[%s2601_s25 + $0x60] sm:$0xff] %v924_v47  ;;  %s1043_s4 = smul.u32 192, %s3762_s5  ;;  %s3707_s10 = smov %s3762_s5 }
 0x139   : >> { %1007 = vst [vmem:[%s2601_s25 + $0x68] sm:$0xff] %v926_v48  ;;  %1009 = vst [vmem:[%s2601_s25 + $0x70] sm:$0xff] %v928_v49  ;;  %v936_v53 = vld [vmem:[%s2605_s9 + $0xa0] sm:$0xff]  ;;  %v938_v54 = vld [vmem:[%s2605_s9 + $0xa8] sm:$0xff] }
 0x13a   : >> { %v940_v55 = vld [vmem:[%s2605_s9 + $0xb0] sm:$0xff]  ;;  %1011 = vst [vmem:[%s2601_s25 + $0x78] sm:$0xff] %v930_v50  ;;  %1013 = vst [vmem:[%s2601_s25 + $0x80] sm:$0xff] %v932_v51  ;;  %v942_v56 = vld [vmem:[%s2605_s9 + $0xb8] sm:$0xff]  ;;  %s1046_s0 = scalar_lea.vmem %s3030_s29, %s1043_s4 [#allocation3]  }
 0x13b   : >> { %1015 = vst [vmem:[%s2601_s25 + $0x88] sm:$0xff] %v934_v52  ;;  %v904_v57 = vld [vmem:[%s2605_s9 + $0x20] sm:$0xff]  ;;  %v906_v58 = vld [vmem:[%s2605_s9 + $0x28] sm:$0xff]  ;;  %1017 = vst [vmem:[%s2601_s25 + $0x90] sm:$0xff] %v936_v53 }
 0x13c   : >> { %1019 = vst [vmem:[%s2601_s25 + $0x98] sm:$0xff] %v938_v54  ;;  %1021 = vst [vmem:[%s2601_s25 + $0xa0] sm:$0xff] %v940_v55  ;;  %v984_v59 = vld [vmem:[%s2605_s9 + $0xc0] sm:$0xff]  ;;  %v986_v60 = vld [vmem:[%s2605_s9 + $0xc8] sm:$0xff] }
 0x13d   : >> { %v988_v61 = vld [vmem:[%s2605_s9 + $0xd0] sm:$0xff]  ;;  %945 = vst [vmem:[%s2601_s25 + $0x18] sm:$0xff] %v904_v57  ;;  %947 = vst [vmem:[%s2601_s25 + $0x20] sm:$0xff] %v906_v58  ;;  %v990_v62 = vld [vmem:[%s2605_s9 + $0xd8] sm:$0xff] }
 0x13e   : >> { %1023 = vst [vmem:[%s2601_s25 + $0xa8] sm:$0xff] %v942_v56  ;;  %v896_v63 = vld [vmem:[%s2605_s9] sm:$0xff]  ;;  %v898_v0 = vld [vmem:[%s2605_s9 + $0x8] sm:$0xff]  ;;  %1025 = vst [vmem:[%s2601_s25 + $0xb0] sm:$0xff] %v984_v59  ;;  %892 = sbr.rel (!%p889_p11) target bundleno = 308 (0x134), region = 325 }
 0x13f   : >> { %1027 = vst [vmem:[%s2601_s25 + $0xb8] sm:$0xff] %v986_v60  ;;  %1029 = vst [vmem:[%s2601_s25 + $0xc0] sm:$0xff] %v988_v61  ;;  %v900_v1 = vld [vmem:[%s2605_s9 + $0x10] sm:$0xff]  ;;  %v1032_v3 = vld [vmem:[%s2605_s9 + $0xe0] sm:$0xff] }
 0x140   : >> { %897 = vst [vmem:[%s2601_s25] sm:$0xff] %v896_v63  ;;  %899 = vst [vmem:[%s2601_s25 + $0x8] sm:$0xff] %v898_v0  ;;  %v948_v2 = vld [vmem:[%s2605_s9 + $0x30] sm:$0xff]  ;;  %v1034_v4 = vld [vmem:[%s2605_s9 + $0xe8] sm:$0xff] }
 0x141   : >> { %1031 = vst [vmem:[%s2601_s25 + $0xc8] sm:$0xff] %v990_v62  ;;  %901 = vst [vmem:[%s2601_s25 + $0x10] sm:$0xff] %v900_v1  ;;  %v1036_v5 = vld [vmem:[%s2605_s9 + $0xf0] sm:$0xff]  ;;  %v1038_v6 = vld [vmem:[%s2605_s9 + $0xf8] sm:$0xff]  ;;  %s1045_s9 = scalar_lea.vmem %s3026_s6, %s1043_s4  }
 0x142   : >> { %949 = vst [vmem:[%s2601_s25 + $0x28] sm:$0xff] %v948_v2  ;;  %1033 = vst [vmem:[%s2601_s25 + $0xd0] sm:$0xff] %v1032_v3 }
 0x143   : >> { %1035 = vst [vmem:[%s2601_s25 + $0xd8] sm:$0xff] %v1034_v4  ;;  %1037 = vst [vmem:[%s2601_s25 + $0xe0] sm:$0xff] %v1036_v5 }
 0x144   : >> { %1039 = vst [vmem:[%s2601_s25 + $0xe8] sm:$0xff] %v1038_v6  ;;  %s3706_s25 = smov %s1046_s0 }
 0x145 PF: > { %2293 = sdivrem.u32 %s882_s8, 24 }
 0x146   : > { %s1927_s20 = smul.u32 3072, %s3180_s11 }
 0x148   : > { %s1051_s28 = sshra.s32 %s1927_s20, 4 }
 0x149   : > { %s3287_s30 = scalar_lea.vmem %s3026_s6, %s1051_s28   ;;  %s3290_s23 = scalar_lea.vmem %s3030_s29, %s1051_s28 [#allocation3]  }
 0x14e   : > { %s3292_s4 = spop.drf %2293 }
 0x14f   : > { %p1929_p12 = scmp.le.s32.totalorder %s3292_s4, 0 }
 0x150   : > { %s3708_s25 = smov (!%p1929_p12), %s3290_s23  ;;  %s2619_s9 = smov (!%p1929_p12), %s3287_s30  }
 0x151   : > { %1835 = sbr.rel (%p1929_p12) target bundleno = 354 (0x162), region = 330  ;;  %s2623_s10 = smov (!%p1929_p12), 0  }
 0x152   : > { %s2627_s22 = smov (!%p1929_p12), 0  }
 0x158 LB: >> { %v1067_v7 = vld [vmem:[%s2621_s9] sm:$0xff]  ;;  %s1073_s8 = sadd.s32 1, %s2625_s10  ;;  %s1061_s22 = sadd.s32 1, %s2629_s22   ;;  %s2629_s22 = sphi %s2627_s22, %s1061_s22   ;;  %s2625_s10 = sphi %s2623_s10, %s2624_s10   ;;  %s2621_s9 = sphi %s2619_s9, %s1078_s9   ;;  %s2617_s25 = sphi %s3708_s25, %s1079_s25  }
 0x159   : >> { %v1069_v8 = vld [vmem:[%s2621_s9 + $0x20] sm:$0xff]  ;;  %1068 = vst [vmem:[%s2617_s25] sm:$0xff] %v1067_v7  ;;  %p1074_p3 = scmp.ge.s32.totalorder %s1073_s8, %s3292_s4  ;;  %p1060_p13 = scmp.ge.s32.totalorder %s1061_s22, %s3292_s4 }
 0x15a   : >> { %v1071_v9 = vld [vmem:[%s2621_s9 + $0x40] sm:$0xff]  ;;  %1070 = vst [vmem:[%s2617_s25 + $0x18] sm:$0xff] %v1069_v8 }
 0x15b   : >> { %1072 = vst [vmem:[%s2617_s25 + $0x30] sm:$0xff] %v1071_v9  ;;  %s3764_s8 = smov (%p1074_p3, %s1073_s8), 0  ;;  %1063 = sbr.rel (!%p1060_p13) target bundleno = 344 (0x158), region = 336 }
 0x15c   : >> { %s1930_s11 = sshll.u32 %s3764_s8, 3  ;;  %s2624_s10 = smov %s3764_s8  }
 0x15d   : >> { %s1078_s9 = scalar_lea.vmem %s3287_s30, %s1930_s11   ;;  %s1079_s25 = scalar_lea.vmem %s3290_s23, %s1930_s11 [#allocation3]  }
 0x162 PF: > { %s2633_s5 = smov 0  }
 0x163   : > { %s1080_s0 = sshllo.u32 %s2633_s5, %s3034_s7 }
 0x164   : > { %v1089_v10 = vld [vmem:[%s3173_s27] sm:%s1080_s0] }
 0x165   : > { %v1091_v11 = vld [vmem:[%s3173_s27 + $0x20] sm:%s1080_s0]  ;;  %1090 = vst [vmem:[%s3176_s24] sm:%s1080_s0] %v1089_v10 }
 0x166   : > { %1092 = vst [vmem:[%s3176_s24 + $0x18] sm:%s1080_s0] %v1091_v11  ;;  %v1093_v12 = vld [vmem:[%s3173_s27 + $0x40] sm:%s1080_s0] }
 0x167   : > { %1094 = vst [vmem:[%s3176_s24 + $0x30] sm:%s1080_s0] %v1093_v12 }
 0x168 PF: > { %p1932_p0 = scmp.ge.u32.totalorder %s3028_s21, 8 }
 0x169   : > { %s2634_s20 = smov (!%p1932_p0), 0  }
 0x16a   : > { %655 = sbr.rel (%p1932_p0) target bundleno = 369 (0x171), region = 98  ;;  %s656_s7 = sshllo.u32 (!%p1932_p0), %s2634_s20, %s3028_s21 }
 0x16b   : > { %v665_v13 = vld [vmem:[%s3026_s6] sm:%s656_s7] (!%p1932_p0) }
 0x16c   : > { %v667_v14 = vld [vmem:[%s3026_s6 + $0x20] sm:%s656_s7] (!%p1932_p0)  ;;  %666 = vst [vmem:[%s3030_s29] sm:%s656_s7] (!%p1932_p0), %v665_v13 }
 0x16d   : > { %668 = vst [vmem:[%s3030_s29 + $0x18] sm:%s656_s7] (!%p1932_p0), %v667_v14  ;;  %v669_v15 = vld [vmem:[%s3026_s6 + $0x40] sm:%s656_s7] (!%p1932_p0) }
 0x16e   : > { %670 = vst [vmem:[%s3030_s29 + $0x30] sm:%s656_s7] (!%p1932_p0), %v669_v15 }
 0x171 PF: > { %p1933_p1 = scmp.ge.s32.totalorder %s2501_s18, 1  ;;  %p1097_p2 = scmp.lt.s32.totalorder %s2501_s18, 5 }
 0x173   : > { %p1098_p4 = pnand %p1933_p1, %p1097_p2 }
 0x174   : > { %s1104_s21 = sand.u32 (!%p1098_p4), 1, %s2477_s12   ;;  %p1161_p5 = scmp.lt.s32.totalorder (!%p1098_p4), %s2489_s15, 1 }
 0x175   : > { %1101 = sbr.rel (%p1098_p4) target bundleno = 494 (0x1ee), region = 152  ;;  %p1936_p6 = scmp.ne.s32.totalorder (!%p1098_p4), %s2485_s14, 0 }
 0x176   : > { %s1955_s27 = smul.u32 (!%p1098_p4), 72, %s1104_s21 }
 0x178   : > { %s1106_s25 = scalar_lea.vmem (!%p1098_p4), [#allocation2], %s1955_s27  ;;  %s3336_s9 = scalar_lea.vmem (!%p1098_p4), [#allocation3], %s1955_s27 }
 0x17c   : > { %s3766_s15 = smov (!%p1161_p5, %s2489_s15), 1  ;;  %1182 = sbr.rel (%p1936_p6) target bundleno = 387 (0x183), region = 164 }
 0x17d   : > { %s1956_s24 = smul.u32 24, %s3766_s15  ;;  %v2635_v16 = vmov (!%p1936_p6), 0.0  }
 0x17f   : > { %s3329_s28 = scalar_lea.vmem %s3681_s2, %s1956_s24  ;;  %s3334_s4 = scalar_lea.vmem %s3682_s3, %s1956_s24 }
 0x180   : > { %1183 = vst [vmem:[%s3329_s28] sm:$0xff] (!%p1936_p6), %v2635_v16  ;;  %1184 = vst [vmem:[%s3329_s28 + $0x8] sm:$0xff] (!%p1936_p6), %v2635_v16 }
 0x181   : > { %1185 = vst [vmem:[%s3329_s28 + $0x10] sm:$0x7] (!%p1936_p6), %v2635_v16  ;;  %1186 = vst [vmem:[%s3334_s4] sm:$0xff] (!%p1936_p6), %v2635_v16 }
 0x182   : > { %1187 = vst [vmem:[%s3334_s4 + $0x8] sm:$0xff] (!%p1936_p6), %v2635_v16  ;;  %1188 = vst [vmem:[%s3334_s4 + $0x10] sm:$0x7] (!%p1936_p6), %v2635_v16 }
 0x183 PF: > { %v3345_v17 = vld [vmem:[%s1106_s25] sm:$0xff]  ;;  %v3347_v18 = vld [vmem:[%s1106_s25 + $0x18] sm:$0xff]  ;;  %v3349_v19 = vld [vmem:[%s1106_s25 + $0x30] sm:$0x7]  ;;  %vm3684_vm0 = vcmask 1042432   ;;  %s1191_s12 = smul.u32 384, %s2485_s14  ;;  %v1192_v38 = vlaneseq }
 0x184   : > { %v1205_v20 = vsel %vm3684_vm0, %v3349_v19, -inf  ;;  %v1206_v21 = vmax.f32 %v3345_v17, %v3347_v18  ;;  %v3355_v22 = vld [vmem:[%s1106_s25 + $0x8] sm:$0xff]  ;;  %v3357_v23 = vld [vmem:[%s1106_s25 + $0x20] sm:$0xff]  ;;  %v3359_v24 = vld [vmem:[%s1106_s25 + $0x38] sm:$0x7] }
 0x185   : > { %v1319_v25 = vsel %vm3684_vm0, %v3359_v24, -inf  ;;  %v3363_v26 = vld [vmem:[%s1106_s25 + $0x10] sm:$0xff]  ;;  %v3365_v27 = vld [vmem:[%s1106_s25 + $0x28] sm:$0xff]  ;;  %v1320_v29 = vmax.f32 %v3355_v22, %v3357_v23  ;;  %v3369_v30 = vld [vmem:[%s1106_s25 + $0x40] sm:$0x7]  ;;  %v3376_v42 = vshrl.u32 %v1192_v38, 7  ;;  %v1241_v47 = vstv %s1191_s12 }
 0x186   : > { %v1207_v28 = vmax.f32 %v1206_v21, %v1205_v20  ;;  %v1434_v31 = vmax.f32 %v3363_v26, %v3365_v27  ;;  %v1433_v34 = vsel %vm3684_vm0, %v3369_v30, -inf  ;;  %s1354_s15 = sadd.s32 128, %s1191_s12  ;;  %s1468_s10 = sadd.s32 256, %s1191_s12  ;;  %v1197_v46 = vand.u32 127, %v1192_v38 }
 0x187   : > { %v1321_v33 = vmax.f32 %v1320_v29, %v1319_v25  ;;  %v1355_v51 = vstv %s1354_s15  ;;  %v1469_v52 = vstv %s1468_s10  ;;  %v3379_v53 = vadd.s32 8, %v3376_v42 }
 0x188   : > { %v1208_v32 = vrot.slane %v1207_v28, 4  ;;  %v1435_v35 = vmax.f32 %v1434_v31, %v1433_v34  ;;  %v3382_v54 = vadd.s32 16, %v3376_v42  ;;  %v3384_v58 = vadd.s32 %v1241_v47, %v1197_v46 }
 0x189   : > { %v1322_v37 = vrot.slane %v1321_v33, 4  ;;  %v3386_v59 = vadd.s32 %v1355_v51, %v1197_v46  ;;  %v3388_v61 = vadd.s32 %v1469_v52, %v1197_v46  ;;  %v3459_v51 = vld [vmem:[%s3336_s9 + $0x20] sm:$0xff] }
 0x18a   : > { %v1209_v36 = vmax.f32 %v1207_v28, %v1208_v32  ;;  %v1436_v39 = vrot.slane %v1435_v35, 4  ;;  %vm1243_vm11 = vcmp.lt.s32.totalorder %v3384_v58, 460 }
 0x18b   : > { %v1323_v41 = vmax.f32 %v1321_v33, %v1322_v37  ;;  %v1201_v33 = vld [vmem:[%s3336_s9] sm:$0xff] }
 0x18c   : > { %v1210_v40 = vrot.slane %v1209_v36, 2  ;;  %v1437_v43 = vmax.f32 %v1435_v35, %v1436_v39 }
 0x18d   : > { %v1324_v45 = vrot.slane %v1323_v41, 2 }
 0x18e   : > { %v1211_v44 = vmax.f32 %v1209_v36, %v1210_v40  ;;  %v1438_v48 = vrot.slane %v1437_v43, 2  ;;  %v3437_v40 = vld [vmem:[%s3336_s9 + $0x30] sm:$0x7] }
 0x18f   : > { %v1325_v50 = vmax.f32 %v1323_v41, %v1324_v45 }
 0x190   : > { %v1212_v49 = vrot.slane %v1211_v44, 1  ;;  %v1439_v55 = vmax.f32 %v1437_v43, %v1438_v48  ;;  %v3447_v48 = vld [vmem:[%s3336_s9 + $0x8] sm:$0xff] }
 0x191   : > { %v1326_v57 = vrot.slane %v1325_v50, 1 }
 0x192   : > { %v1213_v56 = vmax.f32 %v1211_v44, %v1212_v49  ;;  %v1440_v60 = vrot.slane %v1439_v55, 1 }
 0x193   : > { %v3393_v62 = vmax.f32 %v1325_v50, %v1326_v57 }
 0x194   : > { %vm1214_vm1 = vcmp.eq.f32.partialorder %v3345_v17, %v1213_v56  ;;  %vm1215_vm2 = vcmp.eq.f32.partialorder %v3347_v18, %v1213_v56  ;;  %vm1216_vm3 = vcmp.eq.f32.partialorder %v3349_v19, %v1213_v56  ;;  %v3398_v2 = vmax.f32 %v1439_v55, %v1440_v60  ;;  %v3472_v55 = vld [vmem:[%s3336_s9 + $0x38] sm:$0x7] }
 0x195   : > { %v1217_v63 = vsel %vm1214_vm1, %v3376_v42, 19  ;;  %v1218_v0 = vsel %vm1215_vm2, %v3379_v53, 19  ;;  %v1219_v1 = vsel %vm1216_vm3, %v3382_v54, 19  ;;  %vm1328_vm5 = vcmp.eq.f32.partialorder %v3355_v22, %v3393_v62 }
 0x196   : > { %v1220_v3 = vsel %vm3684_vm0, %v1219_v1, 2147483647  ;;  %vm1221_vm4 = vcmp.lt.s32.totalorder %v1217_v63, %v1218_v0  ;;  %vm1329_vm6 = vcmp.eq.f32.partialorder %v3357_v23, %v3393_v62  ;;  %vm1330_vm7 = vcmp.eq.f32.partialorder %v3359_v24, %v3393_v62 }
 0x197   : > { %v1222_v4 = vsel %vm1221_vm4, %v1217_v63, %v1218_v0  ;;  %v1331_v5 = vsel %vm1328_vm5, %v3376_v42, 19  ;;  %v1332_v6 = vsel %vm1329_vm6, %v3379_v53, 19  ;;  %v1333_v7 = vsel %vm1330_vm7, %v3382_v54, 19 }
 0x198   : > { %vm1223_vm8 = vcmp.lt.s32.totalorder %v1222_v4, %v1220_v3  ;;  %vm1335_vm9 = vcmp.lt.s32.totalorder %v1331_v5, %v1332_v6  ;;  %vm1442_vm10 = vcmp.eq.f32.partialorder %v3363_v26, %v3398_v2  ;;  %v1334_v9 = vsel %vm3684_vm0, %v1333_v7, 2147483647 }
 0x199   : > { %v1224_v8 = vsel %vm1223_vm8, %v1222_v4, %v1220_v3  ;;  %v1336_v10 = vsel %vm1335_vm9, %v1331_v5, %v1332_v6  ;;  %vm1443_vm12 = vcmp.eq.f32.partialorder %v3365_v27, %v3398_v2  ;;  %vm1444_vm14 = vcmp.eq.f32.partialorder %v3369_v30, %v3398_v2 }
 0x19a   : > { %v1225_v11 = vrot.slane %v1224_v8, 4  ;;  %vm1337_vm13 = vcmp.lt.s32.totalorder %v1336_v10, %v1334_v9  ;;  %v1445_v12 = vsel %vm1442_vm10, %v3376_v42, 19  ;;  %v1446_v14 = vsel %vm1443_vm12, %v3379_v53, 19 }
 0x19b   : > { %v1338_v13 = vsel %vm1337_vm13, %v1336_v10, %v1334_v9  ;;  %v1447_v15 = vsel %vm1444_vm14, %v3382_v54, 19  ;;  %v3422_v16 = vsub.f32 %v3345_v17, %v1213_v56  ;;  %vm1449_vm1 = vcmp.lt.s32.totalorder %v1445_v12, %v1446_v14  ;;  %v1202_v17 = vld [vmem:[%s3336_s9 + $0x18] sm:$0xff] }
 0x19c   : > { %vm1226_vm15 = vcmp.lt.s32.totalorder %v1224_v8, %v1225_v11  ;;  %v1339_v20 = vrot.slane %v1338_v13, 4  ;;  %v1448_v21 = vsel %vm3684_vm0, %v1447_v15, 2147483647  ;;  %v1450_v28 = vsel %vm1449_vm1, %v1445_v12, %v1446_v14 }
 0x19d   : > { %v1227_v25 = vsel %vm1226_vm15, %v1224_v8, %v1225_v11  ;;  %v3426_v29 = vsub.f32 %v3347_v18, %v1213_v56  ;;  %v3429_v31 = vsub.f32 %v3349_v19, %v1213_v56  ;;  %vm1451_vm3 = vcmp.lt.s32.totalorder %v1450_v28, %v1448_v21 }
 0x19e   : > { %v1228_v32 = vrot.slane %v1227_v25, 2  ;;  %vm1340_vm2 = vcmp.lt.s32.totalorder %v1338_v13, %v1339_v20  ;;  %v1258_v34 = vmul.f32 1.442695, %v3422_v16  ;;  %v1452_v36 = vsel %vm1451_vm3, %v1450_v28, %v1448_v21  ;;  %v1539_v21 = vld [vmem:[%s3329_s28] sm:$0xff] }
 0x19f   : > { %v1341_v35 = vsel %vm1340_vm2, %v1338_v13, %v1339_v20  ;;  %v1260_v37 = vmul.f32 1.442695, %v3426_v29  ;;  %v1262_v38 = vmul.f32 1.442695, %v3429_v31  ;;  %v1453_v18 = vrot.slane %v1452_v36, 4 }
 0x1a0   : > { %vm1229_vm4 = vcmp.lt.s32.totalorder %v1227_v25, %v1228_v32  ;;  %v1342_v39 = vrot.slane %v1341_v35, 2  ;;  %2295 = vpow2.f32 %v1258_v34  ;;  %vm1237_vm5 = vcmp.ne.f32.partialorder %v1201_v33, -1.0 }
 0x1a1   : > { %v1230_v19 = vsel %vm1229_vm4, %v1227_v25, %v1228_v32  ;;  %vm1238_vm6 = vcmp.ne.f32.partialorder %v1202_v17, -1.0  ;;  %2297 = vpow2.f32 %v1260_v37  ;;  %vm1454_vm8 = vcmp.lt.s32.totalorder %v1452_v36, %v1453_v18  ;;  %vm3442_vm12 = vmand %vm1237_vm5, %vm1243_vm11 }
 0x1a2   : > { %v1231_v41 = vrot.slane %v1230_v19, 1  ;;  %vm1343_vm7 = vcmp.lt.s32.totalorder %v1341_v35, %v1342_v39  ;;  %2299 = vpow2.f32 %v1262_v38  ;;  %v1455_v44 = vsel %vm1454_vm8, %v1452_v36, %v1453_v18  ;;  %vm3454_vm15 = vmand %vm1238_vm6, %vm1243_vm11  ;;  %v1541_v38 = vld [vmem:[%s3329_s28 + $0x10] sm:$0x7] }
 0x1a3   : > { %v1344_v43 = vsel %vm1343_vm7, %v1341_v35, %v1342_v39  ;;  %vm1239_vm9 = vcmp.ne.f32.partialorder %v3437_v40, -1.0  ;;  %v1456_v46 = vrot.slane %v1455_v44, 2  ;;  %vm1357_vm13 = vcmp.lt.s32.totalorder %v3386_v59, 460 }
 0x1a4   : > { %vm1232_vm10 = vcmp.lt.s32.totalorder %v1230_v19, %v1231_v41  ;;  %v1345_v45 = vrot.slane %v1344_v43, 1  ;;  %vm1471_vm14 = vcmp.lt.s32.totalorder %v3388_v61, 460  ;;  %vm3467_vm5 = vmand %vm1239_vm9, %vm1243_vm11  ;;  %v3482_v63 = vsel %vm3442_vm12, %v1201_v33, 0.0 }
 0x1a5   : > { %v1233_v49 = vsel %vm1232_vm10, %v1230_v19, %v1231_v41  ;;  %vm1457_vm3 = vcmp.lt.s32.totalorder %v1455_v44, %v1456_v46  ;;  %vm1351_vm7 = vcmp.ne.f32.partialorder %v3447_v48, -1.0  ;;  %vm1352_vm0 = vcmp.ne.f32.partialorder %v3459_v51, -1.0 }
 0x1a6   : > { %vm1234_vm1 = vcmp.eq.s32.totalorder %v3376_v42, %v1233_v49  ;;  %vm1346_vm2 = vcmp.lt.s32.totalorder %v1344_v43, %v1345_v45  ;;  %vm1235_vm4 = vcmp.eq.s32.totalorder %v3379_v53, %v1233_v49  ;;  %v1458_v60 = vsel %vm1457_vm3, %v1455_v44, %v1456_v46 }
 0x1a7   : > { %vm3476_vm6 = vmand %vm1234_vm1, %vm1243_vm11  ;;  %v1347_v57 = vsel %vm1346_vm2, %v1344_v43, %v1345_v45  ;;  %v1459_v0 = vrot.slane %v1458_v60, 1  ;;  %vm1236_vm1 = vcmp.eq.s32.totalorder %v3382_v54, %v1233_v49  ;;  %v3496_v1 = vsel %vm3454_vm15, %v1202_v17, 0.0  ;;  %v1540_v17 = vld [vmem:[%s3329_s28 + $0x8] sm:$0xff]  ;;  %v1947_v49 = vld [vmem:[%s3336_s9 + $0x28] sm:$0xff] }
 0x1a8   : > { %vm1348_vm8 = vcmp.eq.s32.totalorder %v3376_v42, %v1347_v57  ;;  %vm1247_vm9 = vmand %vm1235_vm4, %vm1243_vm11  ;;  %vm1349_vm10 = vcmp.eq.s32.totalorder %v3379_v53, %v1347_v57  ;;  %vm1350_vm12 = vcmp.eq.s32.totalorder %v3382_v54, %v1347_v57  ;;  %vm1353_vm3 = vcmp.ne.f32.partialorder %v3472_v55, -1.0 }
 0x1a9   : > { %vm1360_vm2 = vmand %vm1348_vm8, %vm1357_vm13  ;;  %v3501_v3 = vsub.f32 %v3355_v22, %v3393_v62  ;;  %v2636_v5 = vmov 0.0   ;;  %vm1460_vm4 = vcmp.lt.s32.totalorder %v1458_v60, %v1459_v0  ;;  %v3523_v12 = vsub.f32 %v3357_v23, %v3393_v62 }
 0x1aa   : > { %v2296_v4 = vpop.eup %2295  ;;  %v3505_v6 = vsel %vm3476_vm6, 1.0, %v2636_v5  ;;  %v3507_v7 = vsel %vm1360_vm2, 1.0, %v2636_v5  ;;  %v3509_v8 = vsel %vm1247_vm9, 1.0, %v2636_v5  ;;  %vm1361_vm15 = vmand %vm1349_vm10, %vm1357_vm13  ;;  %v1461_v22 = vsel %vm1460_vm4, %v1458_v60, %v1459_v0  ;;  %v1948_v0 = vld [vmem:[%s3336_s9 + $0x40] sm:$0x7] }
 0x1ab   : > { %v2298_v9 = vpop.eup %2297  ;;  %v1416_v10 = vadd.f32 %v3507_v7, %v3505_v6  ;;  %v3515_v11 = vsel %vm1361_vm15, 1.0, %v2636_v5  ;;  %vm1248_vm6 = vmand %vm1236_vm1, %vm1243_vm11  ;;  %vm1462_vm8 = vcmp.eq.s32.totalorder %v3376_v42, %v1461_v22  ;;  %vm1463_vm9 = vcmp.eq.s32.totalorder %v3379_v53, %v1461_v22 }
 0x1ac   : > { %v2300_v13 = vpop.eup %2299  ;;  %v1417_v14 = vadd.f32 %v3515_v11, %v3509_v8  ;;  %v3529_v15 = vsel %vm1248_vm6, 1.0, %v2636_v5  ;;  %vm1362_vm10 = vmand %vm1350_vm12, %vm1357_vm13  ;;  %vm1464_vm2 = vcmp.eq.s32.totalorder %v3382_v54, %v1461_v22  ;;  %v1264_v42 = vadd.f32 %v2298_v9, %v2296_v4 }
 0x1ad   : > { %vm1474_vm1 = vmand %vm1462_vm8, %vm1471_vm14  ;;  %v3537_v23 = vsel %vm1362_vm10, 1.0, %v2636_v5  ;;  %vm3717_vm4 = vcmask 1042432   ;;  %v1371_v28 = vsub.f32 %v3359_v24, %v3393_v62  ;;  %v1372_v32 = vmul.f32 1.442695, %v3501_v3  ;;  %v1946_v62 = vld [vmem:[%s3336_s9 + $0x10] sm:$0xff] }
 0x1ae   : > { %v1265_v20 = vsel %vm3717_vm4, %v2300_v13, 0.0  ;;  %v3541_v53 = vsel %vm1474_vm1, 1.0, %v2636_v5  ;;  %vm1475_vm15 = vmand %vm1463_vm9, %vm1471_vm14  ;;  %v1418_v25 = vadd.f32 %v3537_v23, %v3529_v15  ;;  %v1374_v35 = vmul.f32 1.442695, %v3523_v12 }
 0x1af   : > { %v1530_v54 = vadd.f32 %v3541_v53, %v1416_v10  ;;  %v3552_v33 = vsel %vm1475_vm15, 1.0, %v2636_v5  ;;  %vm1476_vm12 = vmand %vm1464_vm2, %vm1471_vm14  ;;  %v1266_v34 = vadd.f32 %v1265_v20, %v1264_v42  ;;  %v1277_v24 = vsel %vm3467_vm5, %v3437_v40, 0.0 }
 0x1b0   : > { %v1531_v36 = vadd.f32 %v3552_v33, %v1417_v14  ;;  %v3559_v37 = vsel %vm1476_vm12, 1.0, %v2636_v5  ;;  %2301 = vpow2.f32 %v1372_v32  ;;  %vm3571_vm6 = vmand %vm1351_vm7, %vm1357_vm13  ;;  %v1376_v44 = vmul.f32 1.442695, %v1371_v28 }
 0x1b1   : > { %v1542_v39 = vadd.f32 %v1539_v21, %v1530_v54  ;;  %v1532_v18 = vadd.f32 %v3559_v37, %v1418_v25  ;;  %v1267_v19 = vrot.slane %v1266_v34, 4  ;;  %2303 = vpow2.f32 %v1374_v35  ;;  %vm3582_vm5 = vmand %vm1352_vm0, %vm1357_vm13 }
 0x1b2   : > { %v1543_v43 = vadd.f32 %v1540_v17, %v1531_v36  ;;  %v1278_v46 = vadd.f32 %v3496_v1, %v3482_v63  ;;  %vm1465_vm7 = vcmp.ne.f32.partialorder %v1946_v62, -1.0  ;;  %vm3722_vm8 = vmmov %vm3717_vm4  ;;  %v1287_v52 = vmul.f32 %v3482_v63, %v3422_v16 }
 0x1b3   : > { %1545 = vst [vmem:[%s3329_s28] sm:$0xff] %v1542_v39  ;;  %v1544_v40 = vadd.f32 %v1541_v38, %v1532_v18  ;;  %v1268_v45 = vadd.f32 %v1267_v19, %v1266_v34  ;;  %v1279_v50 = vsel %vm3722_vm8, %v1277_v24, 0.0  ;;  %vm1365_vm9 = vmand %vm1353_vm3, %vm1357_vm13  ;;  %2305 = vpow2.f32 %v1376_v44 }
 0x1b4   : > { %1546 = vst [vmem:[%s3329_s28 + $0x8] sm:$0xff] %v1543_v43  ;;  %v1389_v56 = vsel %vm3571_vm6, %v3447_v48, 0.0  ;;  %v1288_v60 = vmul.f32 %v3496_v1, %v3426_v29  ;;  %v1483_v4 = vsub.f32 %v3363_v26, %v3398_v2  ;;  %v1484_v16 = vsub.f32 %v3365_v27, %v3398_v2  ;;  %vm3618_vm10 = vmand %vm1465_vm7, %vm1471_vm14 }
 0x1b5   : > { %1547 = vst [vmem:[%s3329_s28 + $0x10] sm:$0x7] %v1544_v40  ;;  %v1269_v57 = vrot.slane %v1268_v45, 2  ;;  %v1289_v63 = vmul.f32 %v1277_v24, %v3429_v31  ;;  %v1390_v5 = vsel %vm3582_vm5, %v3459_v51, 0.0  ;;  %vm1466_vm0 = vcmp.ne.f32.partialorder %v1947_v49, -1.0  ;;  %vm3725_vm1 = vmmov %vm3717_vm4 }
 0x1b6   : > { %v1485_v48 = vsub.f32 %v3369_v30, %v3398_v2  ;;  %v1280_v9 = vadd.f32 %v1279_v50, %v1278_v46  ;;  %v1391_v29 = vsel %vm1365_vm9, %v3472_v55, 0.0  ;;  %v1486_v1 = vmul.f32 1.442695, %v1483_v4  ;;  %vm1478_vm2 = vmand %vm1466_vm0, %vm1471_vm14 }
 0x1b7   : > { %v1488_v10 = vmul.f32 1.442695, %v1484_v16  ;;  %v1270_v22 = vadd.f32 %v1269_v57, %v1268_v45  ;;  %vm1467_vm3 = vcmp.ne.f32.partialorder %v1948_v0, -1.0  ;;  %v1290_v13 = vadd.f32 %v1288_v60, %v1287_v52  ;;  %vm3726_vm15 = vmmov %vm3725_vm1 }
 0x1b8   : > { %v1490_v26 = vmul.f32 1.442695, %v1485_v48  ;;  %v1401_v27 = vmul.f32 %v1389_v56, %v3501_v3  ;;  %v1402_v31 = vmul.f32 %v1390_v5, %v3523_v12  ;;  %2307 = vpow2.f32 %v1486_v1  ;;  %vm1479_vm4 = vmand %vm1467_vm3, %vm1471_vm14 }
 0x1b9   : > { %v1291_v2 = vsel %vm3725_vm1, %v1289_v63, 0.0  ;;  %v1403_v55 = vmul.f32 %v1391_v29, %v1371_v28  ;;  %2309 = vpow2.f32 %v1488_v10  ;;  %v1281_v14 = vrot.slane %v1280_v9, 4  ;;  %vm3727_vm12 = vmmov %vm3725_vm1 }
 0x1ba   : > { %v2302_v30 = vpop.eup %2301  ;;  %v1392_v12 = vadd.f32 %v1390_v5, %v1389_v56  ;;  %2311 = vpow2.f32 %v1490_v26  ;;  %v1271_v42 = vrot.slane %v1270_v22, 1  ;;  %v1393_v21 = vsel %vm3726_vm15, %v1391_v29, 0.0  ;;  %vm3728_vm6 = vmmov %vm3725_vm1 }
 0x1bb   : > { %v2304_v3 = vpop.eup %2303  ;;  %v1292_v25 = vadd.f32 %v1291_v2, %v1290_v13  ;;  %v1404_v32 = vadd.f32 %v1402_v31, %v1401_v27  ;;  %v1503_v28 = vsel %vm3618_vm10, %v1946_v62, 0.0  ;;  %v1504_v54 = vsel %vm1478_vm2, %v1947_v49, 0.0  ;;  %vm3729_vm5 = vmmov %vm3725_vm1 }
 0x1bc   : > { %v1378_v20 = vadd.f32 %v2304_v3, %v2302_v30  ;;  %v1405_v34 = vsel %vm3727_vm12, %v1403_v55, 0.0  ;;  %v1505_v35 = vsel %vm1479_vm4, %v1948_v0, 0.0  ;;  %v1282_v36 = vadd.f32 %v1281_v14, %v1280_v9  ;;  %vm3730_vm7 = vmmov %vm3725_vm1 }
 0x1bd   : > { %v2306_v17 = vpop.eup %2305  ;;  %v1394_v24 = vadd.f32 %v1393_v21, %v1392_v12  ;;  %v1272_v39 = vadd.f32 %v1271_v42, %v1270_v22  ;;  %v1515_v19 = vmul.f32 %v1503_v28, %v1483_v4  ;;  %v1516_v41 = vmul.f32 %v1504_v54, %v1484_v16  ;;  %vm3731_vm8 = vmmov %vm3725_vm1 }
 0x1be   : > { %v1379_v38 = vsel %vm3728_vm6, %v2306_v17, 0.0  ;;  %v1293_v43 = vrot.slane %v1292_v25, 4  ;;  %v1406_v44 = vadd.f32 %v1405_v34, %v1404_v32  ;;  %v1517_v40 = vmul.f32 %v1505_v35, %v1485_v48 }
 0x1bf   : > { %v1380_v18 = vadd.f32 %v1379_v38, %v1378_v20  ;;  %v1506_v46 = vadd.f32 %v1504_v54, %v1503_v28  ;;  %v1395_v62 = vrot.slane %v1394_v24, 4  ;;  %v1507_v49 = vsel %vm3729_vm5, %v1505_v35, 0.0 }
 0x1c0   : > { %2313 = vlog2.f32 %v1272_v39  ;;  %v1283_v52 = vrot.slane %v1282_v36, 2  ;;  %v1518_v57 = vadd.f32 %v1516_v41, %v1515_v19  ;;  %v1294_v0 = vadd.f32 %v1293_v43, %v1292_v25 }
 0x1c1   : > { %v1381_v45 = vrot.slane %v1380_v18, 4  ;;  %v1407_v63 = vrot.slane %v1406_v44, 4  ;;  %v1519_v4 = vsel %vm3730_vm7, %v1517_v40, 0.0  ;;  %v1508_v9 = vadd.f32 %v1507_v49, %v1506_v46 }
 0x1c2   : > { %v2308_v47 = vpop.eup %2307  ;;  %v1396_v29 = vadd.f32 %v1395_v62, %v1394_v24  ;;  %v1284_v10 = vadd.f32 %v1283_v52, %v1282_v36  ;;  %v1520_v26 = vadd.f32 %v1519_v4, %v1518_v57  ;;  %v1295_v13 = vrot.slane %v1294_v0, 2 }
 0x1c3   : > { %v2310_v50 = vpop.eup %2309  ;;  %v1382_v56 = vadd.f32 %v1381_v45, %v1380_v18  ;;  %v1408_v27 = vadd.f32 %v1407_v63, %v1406_v44  ;;  %v1509_v30 = vrot.slane %v1508_v9, 4 }
 0x1c4   : > { %v2312_v60 = vpop.eup %2311  ;;  %v1492_v5 = vadd.f32 %v2310_v50, %v2308_v47  ;;  %v1397_v2 = vrot.slane %v1396_v29, 2  ;;  %v1285_v3 = vrot.slane %v1284_v10, 1  ;;  %v1521_v12 = vrot.slane %v1520_v26, 4 }
 0x1c5   : > { %v1383_v16 = vrot.slane %v1382_v56, 2  ;;  %v1493_v48 = vsel %vm3731_vm8, %v2312_v60, 0.0  ;;  %v1296_v42 = vadd.f32 %v1295_v13, %v1294_v0  ;;  %v1409_v20 = vrot.slane %v1408_v27, 2 }
 0x1c6   : > { %v1494_v1 = vadd.f32 %v1493_v48, %v1492_v5  ;;  %v1510_v32 = vadd.f32 %v1509_v30, %v1508_v9  ;;  %v1398_v28 = vadd.f32 %v1397_v2, %v1396_v29  ;;  %v1286_v17 = vadd.f32 %v1285_v3, %v1284_v10  ;;  %v1549_v30 = vld [vmem:[%s3334_s4 + $0x8] sm:$0xff] }
 0x1c7   : > { %v1384_v22 = vadd.f32 %v1383_v16, %v1382_v56  ;;  %v1522_v34 = vadd.f32 %v1521_v12, %v1520_v26  ;;  %v1297_v36 = vrot.slane %v1296_v42, 1  ;;  %v1410_v38 = vadd.f32 %v1409_v20, %v1408_v27 }
 0x1c8   : > { %v1495_v31 = vrot.slane %v1494_v1, 4  ;;  %v1511_v39 = vrot.slane %v1510_v32, 2  ;;  %v1399_v18 = vrot.slane %v1398_v28, 1 }
 0x1c9   : > { %v1385_v51 = vrot.slane %v1384_v22, 1  ;;  %v1523_v41 = vrot.slane %v1522_v34, 2  ;;  %v1298_v43 = vadd.f32 %v1297_v36, %v1296_v42  ;;  %v1411_v40 = vrot.slane %v1410_v38, 1 }
 0x1ca   : > { %v1496_v55 = vadd.f32 %v1495_v31, %v1494_v1  ;;  %v2314_v25 = vpop.eup %2313  ;;  %v1512_v45 = vadd.f32 %v1511_v39, %v1510_v32  ;;  %v1400_v46 = vadd.f32 %v1399_v18, %v1398_v28 }
 0x1cb   : > { %v1386_v14 = vadd.f32 %v1385_v51, %v1384_v22  ;;  %v1274_v35 = vmul.f32 0.6931472, %v2314_v25  ;;  %v1524_v62 = vadd.f32 %v1523_v41, %v1522_v34  ;;  %v1412_v52 = vadd.f32 %v1411_v40, %v1410_v38 }
 0x1cc   : > { %v1497_v21 = vrot.slane %v1496_v55, 2  ;;  %v1513_v56 = vrot.slane %v1512_v45, 1 }
 0x1cd   : > { %2315 = vlog2.f32 %v1386_v14  ;;  %v1299_v44 = vmul.f32 %v1286_v17, %v1274_v35  ;;  %v1525_v60 = vrot.slane %v1524_v62, 1 }
 0x1ce   : > { %v1498_v54 = vadd.f32 %v1497_v21, %v1496_v55  ;;  %v1514_v5 = vadd.f32 %v1513_v56, %v1512_v45 }
 0x1cf   : > { %v1300_v49 = vsub.f32 %v1299_v44, %v1298_v43  ;;  %v1526_v29 = vadd.f32 %v1525_v60, %v1524_v62 }
 0x1d0   : > { %v1499_v24 = vrot.slane %v1498_v54, 1 }
 0x1d1   : > { %v1301_v0 = vsel %vm1243_vm11, %v1300_v49, 0.0 }
 0x1d2   : > { %v1500_v19 = vadd.f32 %v1499_v24, %v1498_v54  ;;  %v1305_v48 = vmul.f32 %v1301_v0, %v3505_v6  ;;  %v1306_v1 = vmul.f32 %v1301_v0, %v3509_v8  ;;  %v1307_v22 = vmul.f32 %v1301_v0, %v3529_v15  ;;  %v1548_v15 = vld [vmem:[%s3334_s4] sm:$0xff] }
 0x1d4   : > { %2317 = vlog2.f32 %v1500_v19 }
 0x1d7   : > { %v2316_v47 = vpop.eup %2315 }
 0x1d8   : > { %v1388_v50 = vmul.f32 0.6931472, %v2316_v47 }
 0x1da   : > { %v1413_v57 = vmul.f32 %v1400_v46, %v1388_v50 }
 0x1dc   : > { %v1414_v63 = vsub.f32 %v1413_v57, %v1412_v52 }
 0x1de   : > { %v2318_v4 = vpop.eup %2317  ;;  %v1415_v16 = vsel %vm1357_vm13, %v1414_v63, 0.0 }
 0x1df   : > { %v1502_v9 = vmul.f32 0.6931472, %v2318_v4  ;;  %v1419_v10 = vmul.f32 %v1415_v16, %v3507_v7  ;;  %v1420_v58 = vmul.f32 %v1415_v16, %v3515_v11  ;;  %v1421_v26 = vmul.f32 %v1415_v16, %v3537_v23  ;;  %v1550_v23 = vld [vmem:[%s3334_s4 + $0x10] sm:$0x7] }
 0x1e1   : > { %v1527_v13 = vmul.f32 %v1514_v5, %v1502_v9  ;;  %v1422_v27 = vadd.f32 %v1419_v10, %v1305_v48  ;;  %v1423_v6 = vadd.f32 %v1420_v58, %v1306_v1  ;;  %v1424_v31 = vadd.f32 %v1421_v26, %v1307_v22 }
 0x1e3   : > { %v1528_v59 = vsub.f32 %v1527_v13, %v1526_v29 }
 0x1e5   : > { %v1529_v8 = vsel %vm1471_vm14, %v1528_v59, 0.0 }
 0x1e6   : > { %v1533_v51 = vmul.f32 %v1529_v8, %v3541_v53  ;;  %v1534_v7 = vmul.f32 %v1529_v8, %v3552_v33  ;;  %v1535_v11 = vmul.f32 %v1529_v8, %v3559_v37 }
 0x1e8   : > { %v1536_v2 = vadd.f32 %v1533_v51, %v1422_v27  ;;  %v1537_v55 = vadd.f32 %v1534_v7, %v1423_v6  ;;  %v1538_v3 = vadd.f32 %v1535_v11, %v1424_v31 }
 0x1ea   : > { %v1551_v14 = vadd.f32 %v1548_v15, %v1536_v2  ;;  %v1552_v12 = vadd.f32 %v1549_v30, %v1537_v55  ;;  %v1553_v42 = vadd.f32 %v1550_v23, %v1538_v3 }
 0x1ec   : > { %1554 = vst [vmem:[%s3334_s4] sm:$0xff] %v1551_v14  ;;  %1555 = vst [vmem:[%s3334_s4 + $0x8] sm:$0xff] %v1552_v12 }
 0x1ed   : > { %1556 = vst [vmem:[%s3334_s4 + $0x10] sm:$0x7] %v1553_v42 }
 0x1ee PF: > { %s14_s18 = sadd.s32 1, %s2501_s18   ;;  %s3732_s22 = sld [smem:[#allocation4_spill]] }
 0x1ef   : > { %p11_p7 = scmp.ge.s32.totalorder %s14_s18, 6   ;;  %s3733_s12 = smov %s2481_s13 }
 0x1f0   : > { %s3734_s13 = smov %s2712_s26  ;;  %s3735_s14 = smov %s2493_s16 }
 0x1f1   : > { %s3736_s15 = smov %s2497_s17  ;;  %s3737_s16 = smov %s3740_s19 }
 0x1f2   :  { %13 = sbr.rel (!%p11_p7) target bundleno = 6 (0x6), region = 347 }
 0x1f4   : > { %s3738_s17 = smov %s3732_s22 }

</bundles_post_ra>
